<compile_context>
chip_gen: v7x
topology: tpu7x:2x2x1
jax: 0.10.0
libtpu: 0.0.40
codegen_flags: <defaults>
</compile_context>

<pallas_src>
import functools
import math

import jax
import jax.numpy as jnp
from jax import lax
from jax.experimental import pallas as pl
from jax.experimental.pallas import tpu as pltpu


def _layernorm(x, gamma, beta, eps):
    mu = jnp.mean(x, axis=-1, keepdims=True)
    var = jnp.mean((x - mu) ** 2, axis=-1, keepdims=True)
    return (x - mu) * lax.rsqrt(var + eps) * gamma + beta


def _encoder_kernel(
    x_ref, bias_ref,
    wq_ref, wk_ref, wv_ref, wo_ref, bo_ref,
    g1_ref, b1_ref,
    w1_ref, bb1_ref, w2_ref, bb2_ref,
    g2_ref, b2_ref,
    out_ref,
    *, n_layers, heads, seq_len, emb, inv_scale, eps,
):
    L, E, H = seq_len, emb, heads

    x = x_ref[...].reshape(L, E)          # (L, E) f32 activation of this batch element
    bias = bias_ref[...]                  # (1, 1, L) additive padding-mask bias

    # Statically unrolled layer loop (n_layers is small); the activation lives
    # in registers/VMEM values across layers, never round-tripping through HBM.
    for l in range(n_layers):
        xb16 = x.astype(jnp.bfloat16)
        xb = jnp.broadcast_to(xb16.reshape(1, L, E), (H, L, E))

        # Head-batched projections: weights are pre-split per head in the
        # wrapper, so no per-head Python loop / lane slices / transposes.
        q = jnp.einsum('hle,hed->hld', xb, wq_ref[l],
                       preferred_element_type=jnp.float32)      # (H, L, D)
        k = jnp.einsum('hle,hed->hld', xb, wk_ref[l],
                       preferred_element_type=jnp.float32)      # (H, L, D)
        v = jnp.einsum('hle,hed->hld', xb, wv_ref[l],
                       preferred_element_type=jnp.float32)      # (H, L, D)

        # PyTorch: energy / sqrt(head_dim).  Scale Q in f32 before the bf16
        # cast (small (H,L,D) tensor) instead of scaling the (H,L,L) energy.
        q = q * inv_scale

        energy = jnp.einsum('hqd,hkd->hqk',
                            q.astype(jnp.bfloat16), k.astype(jnp.bfloat16),
                            preferred_element_type=jnp.float32)  # (H, L, L)
        energy = energy + bias                                   # mask bias (bcast)

        m = jnp.max(energy, axis=-1, keepdims=True)
        p = jnp.exp(energy - m)
        # approx reciprocal on the EUP: attention rows sum to 1 +/- ~2^-8.
        attn = p * pl.reciprocal(jnp.sum(p, axis=-1, keepdims=True), approx=True)

        ctx = jnp.einsum('hqk,hkd->hqd',
                         attn.astype(jnp.bfloat16), v.astype(jnp.bfloat16),
                         preferred_element_type=jnp.float32)     # (H, L, D)

        # Per-head output projection summed over heads == concat(ctx) @ Wo.
        attn_out = jnp.sum(
            jnp.einsum('hld,hde->hle', ctx.astype(jnp.bfloat16), wo_ref[l],
                       preferred_element_type=jnp.float32),
            axis=0) + bo_ref[l]                                  # (L, E)

        # residual + LayerNorm1  (dropout == identity in eval mode)
        h1 = _layernorm(attn_out + x, g1_ref[l], b1_ref[l], eps)

        # feed-forward: Linear -> ReLU -> Linear
        ff = jnp.dot(h1.astype(jnp.bfloat16), w1_ref[l],
                     preferred_element_type=jnp.float32) + bb1_ref[l]
        ff = jnp.maximum(ff, 0.0)
        ff = jnp.dot(ff.astype(jnp.bfloat16), w2_ref[l],
                     preferred_element_type=jnp.float32) + bb2_ref[l]

        # residual + LayerNorm2
        x = _layernorm(ff + h1, g2_ref[l], b2_ref[l], eps)

    out_ref[...] = x.reshape(1, L, E)


def encoder_forward(tokens, mask4d, params, heads):
    """Encoder.forward: embeddings + positional add, then n_layers blocks (one kernel)."""
    N, L = tokens.shape
    E = params["tok_emb"].shape[1]
    D = E // heads
    n_layers = params["wq"].shape[0]

    # Embedding gathers + positional add (plain-JAX glue); dropout is identity.
    tok_emb = jnp.take(params["tok_emb"], tokens, axis=0)            # (N, L, E)
    pos_emb = jnp.take(params["pos_emb"], jnp.arange(L), axis=0)     # (L, E)
    x = (tok_emb + pos_emb[None, :, :]).astype(jnp.float32)

    # Standard [N,1,1,L] padding mask -> additive bias, computed ONCE.
    bias = jnp.where(mask4d.reshape(N, 1, L) == 0,
                     jnp.float32(-1e20), jnp.float32(0.0))           # (N, 1, L)

    # Head-major weight layouts, built once in the wrapper (outside the kernel):
    #   Wq/Wk/Wv: (n_layers, E, E) -> (n_layers, H, E, D)   (output columns per head)
    #   Wo:       (n_layers, E, E) -> (n_layers, H, D, E)   (input rows per head)
    def split_qkv(w):
        return w.reshape(n_layers, E, heads, D).transpose(0, 2, 1, 3)

    wq_h = split_qkv(params["wq"])
    wk_h = split_qkv(params["wk"])
    wv_h = split_qkv(params["wv"])
    wo_h = params["wo"].reshape(n_layers, heads, D, E)

    kernel = functools.partial(
        _encoder_kernel, n_layers=n_layers, heads=heads, seq_len=L, emb=E,
        inv_scale=1.0 / math.sqrt(D),     # PyTorch scale = sqrt(head_dim)
        eps=1e-5)

    def resident(arr):
        # Whole stacked tensor as one block with a constant index_map:
        # DMA'd once, stays VMEM-resident, indexed per layer inside the kernel.
        return pl.BlockSpec(arr.shape, lambda n, _nd=arr.ndim: (0,) * _nd)

    in_specs = [
        pl.BlockSpec((1, L, E), lambda n: (n, 0, 0)),   # x, one batch element / step
        pl.BlockSpec((1, 1, L), lambda n: (n, 0, 0)),   # additive mask bias
        resident(wq_h), resident(wk_h), resident(wv_h),            # per-head Q/K/V
        resident(wo_h), resident(params["bo"]),                    # per-head Wo, bo
        resident(params["g1"]), resident(params["b1"]),            # LN1
        resident(params["w1"]), resident(params["bb1"]),           # FF W1, b1
        resident(params["w2"]), resident(params["bb2"]),           # FF W2, b2
        resident(params["g2"]), resident(params["b2"]),            # LN2
    ]

    return pl.pallas_call(
        kernel,
        out_shape=jax.ShapeDtypeStruct((N, L, E), jnp.float32),
        grid=(N,),                                       # batch axis: parallel (v7x 2 TCs)
        in_specs=in_specs,
        out_specs=pl.BlockSpec((1, L, E), lambda n: (n, 0, 0)),
        compiler_params=pltpu.CompilerParams(
            dimension_semantics=("parallel",),
            vmem_limit_bytes=32 * 1024 * 1024),          # explicit scoped-VMEM budget
    )(
        x, bias,
        wq_h, wk_h, wv_h, wo_h, params["bo"],
        params["g1"], params["b1"],
        params["w1"], params["bb1"], params["w2"], params["bb2"],
        params["g2"], params["b2"],
    )


def init_params(key, vocab, max_len, emb, heads, forward_expansion, n_layers):
    hidden = forward_expansion * emb

    def nrm(k, shape, scale=0.1):
        return scale * jax.random.normal(k, shape, dtype=jnp.float32)

    k_tok, k_pos, key = jax.random.split(key, 3)
    ks = jax.random.split(key, 9)
    return {
        "tok_emb": nrm(k_tok, (vocab, emb), 1.0),
        "pos_emb": nrm(k_pos, (max_len, emb), 1.0),
        # nn.Linear weights stored pre-transposed (in_features, out_features),
        # stacked over layers; MXU operands kept in bf16.
        "wq": nrm(ks[0], (n_layers, emb, emb)).astype(jnp.bfloat16),
        "wk": nrm(ks[1], (n_layers, emb, emb)).astype(jnp.bfloat16),
        "wv": nrm(ks[2], (n_layers, emb, emb)).astype(jnp.bfloat16),
        "wo": nrm(ks[3], (n_layers, emb, emb)).astype(jnp.bfloat16),
        "bo": nrm(ks[4], (n_layers, 1, emb)),
        "g1": jnp.ones((n_layers, 1, emb), jnp.float32),
        "b1": jnp.zeros((n_layers, 1, emb), jnp.float32),
        "w1": nrm(ks[5], (n_layers, emb, hidden)).astype(jnp.bfloat16),
        "bb1": nrm(ks[6], (n_layers, 1, hidden)),
        "w2": nrm(ks[7], (n_layers, hidden, emb)).astype(jnp.bfloat16),
        "bb2": nrm(ks[8], (n_layers, 1, emb)),
        "g2": jnp.ones((n_layers, 1, emb), jnp.float32),
        "b2": jnp.zeros((n_layers, 1, emb), jnp.float32),
    }


def encoder_reference(tokens, mask4d, params, heads):
    """Pure-JAX reference mirroring the PyTorch Encoder (same bf16 matmul operands)."""
    N, L = tokens.shape
    E = params["tok_emb"].shape[1]
    D = E // heads
    eps = 1e-5
    tok = jnp.take(params["tok_emb"], tokens, axis=0)
    pos = jnp.take(params["pos_emb"], jnp.arange(L), axis=0)
    x = (tok + pos[None]).astype(jnp.float32)
    bias = jnp.where(mask4d.reshape(N, 1, 1, L) == 0, -1e20, 0.0).astype(jnp.float32)

    def ln(v, g, b):
        mu = jnp.mean(v, -1, keepdims=True)
        var = jnp.mean((v - mu) ** 2, -1, keepdims=True)
        return (v - mu) / jnp.sqrt(var + eps) * g + b

    for l in range(params["wq"].shape[0]):
        xb = x.astype(jnp.bfloat16)
        q = jnp.dot(xb, params["wq"][l], preferred_element_type=jnp.float32)
        k = jnp.dot(xb, params["wk"][l], preferred_element_type=jnp.float32)
        v = jnp.dot(xb, params["wv"][l], preferred_element_type=jnp.float32)
        q = q.reshape(N, L, heads, D)
        k = k.reshape(N, L, heads, D)
        v = v.reshape(N, L, heads, D)
        energy = jnp.einsum('nqhd,nkhd->nhqk',
                            q.astype(jnp.bfloat16), k.astype(jnp.bfloat16),
                            preferred_element_type=jnp.float32) / math.sqrt(D)
        attn = jax.nn.softmax(energy + bias, axis=-1)
        ctx = jnp.einsum('nhqk,nkhd->nqhd',
                         attn.astype(jnp.bfloat16), v.astype(jnp.bfloat16),
                         preferred_element_type=jnp.float32).reshape(N, L, E)
        attn_out = jnp.dot(ctx.astype(jnp.bfloat16), params["wo"][l],
                           preferred_element_type=jnp.float32) + params["bo"][l]
        h1 = ln(attn_out + x, params["g1"][l], params["b1"][l])
        ff = jnp.dot(h1.astype(jnp.bfloat16), params["w1"][l],
                     preferred_element_type=jnp.float32) + params["bb1"][l]
        ff = jnp.maximum(ff, 0.0)
        ff = jnp.dot(ff.astype(jnp.bfloat16), params["w2"][l],
                     preferred_element_type=jnp.float32) + params["bb2"][l]
        x = ln(ff + h1, params["g2"][l], params["b2"][l])
    return x


if __name__ == "__main__":
    # Small shapes consistent with the module: batch=2, seq=8, emb=32, heads=4,
    # forward_expansion=4, n_layers=2, vocab=50, max_len=16.
    vocab, max_len = 50, 16
    N, L, E, H, FE, n_layers = 2, 8, 32, 4, 4, 2

    key = jax.random.PRNGKey(0)
    kp, kx = jax.random.split(key)
    params = init_params(kp, vocab, max_len, E, H, FE, n_layers)

    tokens = jax.random.randint(kx, (N, L), 0, vocab, dtype=jnp.int32)
    # standard padding mask [N, 1, 1, L]; mask out the last two key positions
    mask = jnp.ones((N, 1, 1, L), dtype=jnp.float32)
    mask = mask.at[:, :, :, L - 2:].set(0.0)

    out = jax.jit(encoder_forward, static_argnums=3)(tokens, mask, params, H)
    out = jax.block_until_ready(out)
    assert out.shape == (N, L, E)

    ref = encoder_reference(tokens, mask, params, H)
    err = float(jnp.max(jnp.abs(out - ref)))
    assert jnp.allclose(out, ref, atol=3e-2, rtol=3e-2), f"max abs err {err}"

    print("KERNEL_OK")
</pallas_src>

<mosaic_0001>
module attributes {stable_mosaic.version = 11 : i64} {
  func.func @_encoder_kernel(%arg0: i32, %arg1: memref<1x8x32xf32, #tpu.memory_space<vmem>>, %arg2: memref<1x1x8xf32, #tpu.memory_space<vmem>>, %arg3: memref<2x4x32x8xbf16, #tpu.memory_space<vmem>>, %arg4: memref<2x4x32x8xbf16, #tpu.memory_space<vmem>>, %arg5: memref<2x4x32x8xbf16, #tpu.memory_space<vmem>>, %arg6: memref<2x4x8x32xbf16, #tpu.memory_space<vmem>>, %arg7: memref<2x1x32xf32, #tpu.memory_space<vmem>>, %arg8: memref<2x1x32xf32, #tpu.memory_space<vmem>>, %arg9: memref<2x1x32xf32, #tpu.memory_space<vmem>>, %arg10: memref<2x32x128xbf16, #tpu.memory_space<vmem>>, %arg11: memref<2x1x128xf32, #tpu.memory_space<vmem>>, %arg12: memref<2x128x32xbf16, #tpu.memory_space<vmem>>, %arg13: memref<2x1x32xf32, #tpu.memory_space<vmem>>, %arg14: memref<2x1x32xf32, #tpu.memory_space<vmem>>, %arg15: memref<2x1x32xf32, #tpu.memory_space<vmem>>, %arg16: memref<1x8x32xf32, #tpu.memory_space<vmem>>) attributes {dimension_semantics = [#tpu.dimension_semantics<parallel>], iteration_bounds = array<i64: 2>, scalar_prefetch = 0 : i64, scratch_operands = 0 : i64, tpu.core_type = #tpu.core_type<tc>, window_params = [{transform_indices = @transform_0, window_bounds = array<i64: 1, 8, 32>}, {transform_indices = @transform_1, window_bounds = array<i64: 1, 1, 8>}, {pipeline_mode = #tpu.pipeline_mode<synchronous>, transform_indices = @transform_2, window_bounds = array<i64: 2, 4, 32, 8>}, {pipeline_mode = #tpu.pipeline_mode<synchronous>, transform_indices = @transform_3, window_bounds = array<i64: 2, 4, 32, 8>}, {pipeline_mode = #tpu.pipeline_mode<synchronous>, transform_indices = @transform_4, window_bounds = array<i64: 2, 4, 32, 8>}, {pipeline_mode = #tpu.pipeline_mode<synchronous>, transform_indices = @transform_5, window_bounds = array<i64: 2, 4, 8, 32>}, {pipeline_mode = #tpu.pipeline_mode<synchronous>, transform_indices = @transform_6, window_bounds = array<i64: 2, 1, 32>}, {pipeline_mode = #tpu.pipeline_mode<synchronous>, transform_indices = @transform_7, window_bounds = array<i64: 2, 1, 32>}, {pipeline_mode = #tpu.pipeline_mode<synchronous>, transform_indices = @transform_8, window_bounds = array<i64: 2, 1, 32>}, {pipeline_mode = #tpu.pipeline_mode<synchronous>, transform_indices = @transform_9, window_bounds = array<i64: 2, 32, 128>}, {pipeline_mode = #tpu.pipeline_mode<synchronous>, transform_indices = @transform_10, window_bounds = array<i64: 2, 1, 128>}, {pipeline_mode = #tpu.pipeline_mode<synchronous>, transform_indices = @transform_11, window_bounds = array<i64: 2, 128, 32>}, {pipeline_mode = #tpu.pipeline_mode<synchronous>, transform_indices = @transform_12, window_bounds = array<i64: 2, 1, 32>}, {pipeline_mode = #tpu.pipeline_mode<synchronous>, transform_indices = @transform_13, window_bounds = array<i64: 2, 1, 32>}, {pipeline_mode = #tpu.pipeline_mode<synchronous>, transform_indices = @transform_14, window_bounds = array<i64: 2, 1, 32>}, {transform_indices = @transform_15, window_bounds = array<i64: 1, 8, 32>}]} {
    %c0 = arith.constant 0 : index
    %c0_0 = arith.constant 0 : index
    %c0_1 = arith.constant 0 : index
    %0 = vector.load %arg1[%c0, %c0_0, %c0_1] : memref<1x8x32xf32, #tpu.memory_space<vmem>>, vector<1x8x32xf32>
    %1 = vector.shape_cast %0 : vector<1x8x32xf32> to vector<8x32xf32>
    %c0_2 = arith.constant 0 : index
    %c0_3 = arith.constant 0 : index
    %c0_4 = arith.constant 0 : index
    %2 = vector.load %arg2[%c0_2, %c0_3, %c0_4] : memref<1x1x8xf32, #tpu.memory_space<vmem>>, vector<1x1x8xf32>
    %3 = arith.truncf %1 : vector<8x32xf32> to vector<8x32xbf16>
    %4 = vector.shape_cast %3 : vector<8x32xbf16> to vector<1x8x32xbf16>
    %5 = vector.shape_cast %4 : vector<1x8x32xbf16> to vector<1x8x32xbf16>
    %6 = vector.broadcast %5 : vector<1x8x32xbf16> to vector<4x8x32xbf16>
    %c0_5 = arith.constant 0 : index
    %c0_6 = arith.constant 0 : index
    %c0_7 = arith.constant 0 : index
    %c0_8 = arith.constant 0 : index
    %7 = vector.load %arg3[%c0_5, %c0_6, %c0_7, %c0_8] : memref<2x4x32x8xbf16, #tpu.memory_space<vmem>>, vector<1x4x32x8xbf16>
    %8 = vector.shape_cast %7 : vector<1x4x32x8xbf16> to vector<4x32x8xbf16>
    "tpu.trace_start"() <{level = 10 : i32, message = "hle,hed->hld"}> : () -> ()
    %cst = arith.constant dense<0.000000e+00> : vector<4x8x8xf32>
    %9 = tpu.matmul %6, %8, %cst {dimension_numbers = #tpu.dot_dimension_numbers<[2], [1], [1], [2], [0, 0, 0, 1, 1, 2], [0], [0]>} : vector<4x8x32xbf16>, vector<4x32x8xbf16>, vector<4x8x8xf32> -> vector<4x8x8xf32>
    "tpu.trace_stop"() : () -> ()
    %c0_9 = arith.constant 0 : index
    %c0_10 = arith.constant 0 : index
    %c0_11 = arith.constant 0 : index
    %c0_12 = arith.constant 0 : index
    %10 = vector.load %arg4[%c0_9, %c0_10, %c0_11, %c0_12] : memref<2x4x32x8xbf16, #tpu.memory_space<vmem>>, vector<1x4x32x8xbf16>
    %11 = vector.shape_cast %10 : vector<1x4x32x8xbf16> to vector<4x32x8xbf16>
    "tpu.trace_start"() <{level = 10 : i32, message = "hle,hed->hld"}> : () -> ()
    %cst_13 = arith.constant dense<0.000000e+00> : vector<4x8x8xf32>
    %12 = tpu.matmul %6, %11, %cst_13 {dimension_numbers = #tpu.dot_dimension_numbers<[2], [1], [1], [2], [0, 0, 0, 1, 1, 2], [0], [0]>} : vector<4x8x32xbf16>, vector<4x32x8xbf16>, vector<4x8x8xf32> -> vector<4x8x8xf32>
    "tpu.trace_stop"() : () -> ()
    %c0_14 = arith.constant 0 : index
    %c0_15 = arith.constant 0 : index
    %c0_16 = arith.constant 0 : index
    %c0_17 = arith.constant 0 : index
    %13 = vector.load %arg5[%c0_14, %c0_15, %c0_16, %c0_17] : memref<2x4x32x8xbf16, #tpu.memory_space<vmem>>, vector<1x4x32x8xbf16>
    %14 = vector.shape_cast %13 : vector<1x4x32x8xbf16> to vector<4x32x8xbf16>
    "tpu.trace_start"() <{level = 10 : i32, message = "hle,hed->hld"}> : () -> ()
    %cst_18 = arith.constant dense<0.000000e+00> : vector<4x8x8xf32>
    %15 = tpu.matmul %6, %14, %cst_18 {dimension_numbers = #tpu.dot_dimension_numbers<[2], [1], [1], [2], [0, 0, 0, 1, 1, 2], [0], [0]>} : vector<4x8x32xbf16>, vector<4x32x8xbf16>, vector<4x8x8xf32> -> vector<4x8x8xf32>
    "tpu.trace_stop"() : () -> ()
    %cst_19 = arith.constant 0.353553385 : f32
    %16 = vector.broadcast %cst_19 : f32 to vector<4x8x8xf32>
    %17 = arith.mulf %9, %16 : vector<4x8x8xf32>
    %18 = arith.truncf %17 : vector<4x8x8xf32> to vector<4x8x8xbf16>
    %19 = arith.truncf %12 : vector<4x8x8xf32> to vector<4x8x8xbf16>
    "tpu.trace_start"() <{level = 10 : i32, message = "hqd,hkd->hqk"}> : () -> ()
    %cst_20 = arith.constant dense<0.000000e+00> : vector<4x8x8xf32>
    %20 = tpu.matmul %18, %19, %cst_20 {dimension_numbers = #tpu.dot_dimension_numbers<[2], [2], [1], [1], [0, 0, 0, 1, 1, 1], [0], [0]>} : vector<4x8x8xbf16>, vector<4x8x8xbf16>, vector<4x8x8xf32> -> vector<4x8x8xf32>
    "tpu.trace_stop"() : () -> ()
    %21 = vector.broadcast %2 : vector<1x1x8xf32> to vector<4x8x8xf32>
    %22 = arith.addf %20, %21 : vector<4x8x8xf32>
    %cst_21 = arith.constant dense<0xFF800000> : vector<4x8xf32>
    %23 = vector.multi_reduction <maximumf>, %22, %cst_21 [2] : vector<4x8x8xf32> to vector<4x8xf32>
    %24 = vector.shape_cast %23 : vector<4x8xf32> to vector<4x8x1xf32>
    %25 = vector.broadcast %24 : vector<4x8x1xf32> to vector<4x8x8xf32>
    %26 = arith.subf %22, %25 : vector<4x8x8xf32>
    %27 = math.exp %26 : vector<4x8x8xf32>
    %cst_22 = arith.constant dense<0.000000e+00> : vector<4x8xf32>
    %28 = vector.multi_reduction <add>, %27, %cst_22 [2] : vector<4x8x8xf32> to vector<4x8xf32>
    %29 = vector.shape_cast %28 : vector<4x8xf32> to vector<4x8x1xf32>
    %30 = tpu.reciprocal %29 {approx = true} : vector<4x8x1xf32> -> vector<4x8x1xf32>
    %31 = vector.broadcast %30 : vector<4x8x1xf32> to vector<4x8x8xf32>
    %32 = arith.mulf %27, %31 : vector<4x8x8xf32>
    %33 = arith.truncf %32 : vector<4x8x8xf32> to vector<4x8x8xbf16>
    %34 = arith.truncf %15 : vector<4x8x8xf32> to vector<4x8x8xbf16>
    "tpu.trace_start"() <{level = 10 : i32, message = "hqk,hkd->hqd"}> : () -> ()
    %cst_23 = arith.constant dense<0.000000e+00> : vector<4x8x8xf32>
    %35 = tpu.matmul %33, %34, %cst_23 {dimension_numbers = #tpu.dot_dimension_numbers<[2], [1], [1], [2], [0, 0, 0, 1, 1, 2], [0], [0]>} : vector<4x8x8xbf16>, vector<4x8x8xbf16>, vector<4x8x8xf32> -> vector<4x8x8xf32>
    "tpu.trace_stop"() : () -> ()
    %36 = arith.truncf %35 : vector<4x8x8xf32> to vector<4x8x8xbf16>
    %c0_24 = arith.constant 0 : index
    %c0_25 = arith.constant 0 : index
    %c0_26 = arith.constant 0 : index
    %c0_27 = arith.constant 0 : index
    %37 = vector.load %arg6[%c0_24, %c0_25, %c0_26, %c0_27] : memref<2x4x8x32xbf16, #tpu.memory_space<vmem>>, vector<1x4x8x32xbf16>
    %38 = vector.shape_cast %37 : vector<1x4x8x32xbf16> to vector<4x8x32xbf16>
    "tpu.trace_start"() <{level = 10 : i32, message = "hld,hde->hle"}> : () -> ()
    %cst_28 = arith.constant dense<0.000000e+00> : vector<4x8x32xf32>
    %39 = tpu.matmul %36, %38, %cst_28 {dimension_numbers = #tpu.dot_dimension_numbers<[2], [1], [1], [2], [0, 0, 0, 1, 1, 2], [0], [0]>} : vector<4x8x8xbf16>, vector<4x8x32xbf16>, vector<4x8x32xf32> -> vector<4x8x32xf32>
    "tpu.trace_stop"() : () -> ()
    %cst_29 = arith.constant dense<0.000000e+00> : vector<8x32xf32>
    %40 = vector.multi_reduction <add>, %39, %cst_29 [0] : vector<4x8x32xf32> to vector<8x32xf32>
    %c0_30 = arith.constant 0 : index
    %c0_31 = arith.constant 0 : index
    %c0_32 = arith.constant 0 : index
    %41 = vector.load %arg7[%c0_30, %c0_31, %c0_32] : memref<2x1x32xf32, #tpu.memory_space<vmem>>, vector<1x1x32xf32>
    %42 = vector.shape_cast %41 : vector<1x1x32xf32> to vector<1x32xf32>
    %43 = vector.broadcast %42 : vector<1x32xf32> to vector<8x32xf32>
    %44 = arith.addf %40, %43 : vector<8x32xf32>
    %45 = arith.addf %44, %1 : vector<8x32xf32>
    %c0_33 = arith.constant 0 : index
    %c0_34 = arith.constant 0 : index
    %c0_35 = arith.constant 0 : index
    %46 = vector.load %arg8[%c0_33, %c0_34, %c0_35] : memref<2x1x32xf32, #tpu.memory_space<vmem>>, vector<1x1x32xf32>
    %47 = vector.shape_cast %46 : vector<1x1x32xf32> to vector<1x32xf32>
    %c0_36 = arith.constant 0 : index
    %c0_37 = arith.constant 0 : index
    %c0_38 = arith.constant 0 : index
    %48 = vector.load %arg9[%c0_36, %c0_37, %c0_38] : memref<2x1x32xf32, #tpu.memory_space<vmem>>, vector<1x1x32xf32>
    %49 = vector.shape_cast %48 : vector<1x1x32xf32> to vector<1x32xf32>
    %cst_39 = arith.constant dense<0.000000e+00> : vector<8xf32>
    %50 = vector.multi_reduction <add>, %45, %cst_39 [1] : vector<8x32xf32> to vector<8xf32>
    %51 = vector.shape_cast %50 : vector<8xf32> to vector<8x1xf32>
    %cst_40 = arith.constant 3.200000e+01 : f32
    %52 = vector.broadcast %cst_40 : f32 to vector<8x1xf32>
    %53 = arith.divf %51, %52 : vector<8x1xf32>
    %54 = vector.broadcast %53 : vector<8x1xf32> to vector<8x32xf32>
    %55 = arith.subf %45, %54 : vector<8x32xf32>
    %56 = arith.mulf %55, %55 : vector<8x32xf32>
    %cst_41 = arith.constant dense<0.000000e+00> : vector<8xf32>
    %57 = vector.multi_reduction <add>, %56, %cst_41 [1] : vector<8x32xf32> to vector<8xf32>
    %58 = vector.shape_cast %57 : vector<8xf32> to vector<8x1xf32>
    %cst_42 = arith.constant 3.200000e+01 : f32
    %59 = vector.broadcast %cst_42 : f32 to vector<8x1xf32>
    %60 = arith.divf %58, %59 : vector<8x1xf32>
    %61 = vector.broadcast %53 : vector<8x1xf32> to vector<8x32xf32>
    %62 = arith.subf %45, %61 : vector<8x32xf32>
    %cst_43 = arith.constant 9.99999974E-6 : f32
    %63 = vector.broadcast %cst_43 : f32 to vector<8x1xf32>
    %64 = arith.addf %60, %63 : vector<8x1xf32>
    %65 = math.rsqrt %64 : vector<8x1xf32>
    %66 = vector.broadcast %65 : vector<8x1xf32> to vector<8x32xf32>
    %67 = arith.mulf %62, %66 : vector<8x32xf32>
    %68 = vector.broadcast %47 : vector<1x32xf32> to vector<8x32xf32>
    %69 = arith.mulf %67, %68 : vector<8x32xf32>
    %70 = vector.broadcast %49 : vector<1x32xf32> to vector<8x32xf32>
    %71 = arith.addf %69, %70 : vector<8x32xf32>
    %72 = arith.truncf %71 : vector<8x32xf32> to vector<8x32xbf16>
    %c0_44 = arith.constant 0 : index
    %c0_45 = arith.constant 0 : index
    %c0_46 = arith.constant 0 : index
    %73 = vector.load %arg10[%c0_44, %c0_45, %c0_46] : memref<2x32x128xbf16, #tpu.memory_space<vmem>>, vector<1x32x128xbf16>
    %74 = vector.shape_cast %73 : vector<1x32x128xbf16> to vector<32x128xbf16>
    %cst_47 = arith.constant dense<0.000000e+00> : vector<8x128xf32>
    %75 = tpu.matmul %72, %74, %cst_47 {dimension_numbers = #tpu.dot_dimension_numbers<[1], [0], [0], [1], [0, 0, 1, 1], [], []>} : vector<8x32xbf16>, vector<32x128xbf16>, vector<8x128xf32> -> vector<8x128xf32>
    %c0_48 = arith.constant 0 : index
    %c0_49 = arith.constant 0 : index
    %c0_50 = arith.constant 0 : index
    %76 = vector.load %arg11[%c0_48, %c0_49, %c0_50] : memref<2x1x128xf32, #tpu.memory_space<vmem>>, vector<1x1x128xf32>
    %77 = vector.shape_cast %76 : vector<1x1x128xf32> to vector<1x128xf32>
    %78 = vector.broadcast %77 : vector<1x128xf32> to vector<8x128xf32>
    %79 = arith.addf %75, %78 : vector<8x128xf32>
    %cst_51 = arith.constant 0.000000e+00 : f32
    %80 = vector.broadcast %cst_51 : f32 to vector<8x128xf32>
    %81 = arith.maximumf %79, %80 : vector<8x128xf32>
    %82 = arith.truncf %81 : vector<8x128xf32> to vector<8x128xbf16>
    %c0_52 = arith.constant 0 : index
    %c0_53 = arith.constant 0 : index
    %c0_54 = arith.constant 0 : index
    %83 = vector.load %arg12[%c0_52, %c0_53, %c0_54] : memref<2x128x32xbf16, #tpu.memory_space<vmem>>, vector<1x128x32xbf16>
    %84 = vector.shape_cast %83 : vector<1x128x32xbf16> to vector<128x32xbf16>
    %cst_55 = arith.constant dense<0.000000e+00> : vector<8x32xf32>
    %85 = tpu.matmul %82, %84, %cst_55 {dimension_numbers = #tpu.dot_dimension_numbers<[1], [0], [0], [1], [0, 0, 1, 1], [], []>} : vector<8x128xbf16>, vector<128x32xbf16>, vector<8x32xf32> -> vector<8x32xf32>
    %c0_56 = arith.constant 0 : index
    %c0_57 = arith.constant 0 : index
    %c0_58 = arith.constant 0 : index
    %86 = vector.load %arg13[%c0_56, %c0_57, %c0_58] : memref<2x1x32xf32, #tpu.memory_space<vmem>>, vector<1x1x32xf32>
    %87 = vector.shape_cast %86 : vector<1x1x32xf32> to vector<1x32xf32>
    %88 = vector.broadcast %87 : vector<1x32xf32> to vector<8x32xf32>
    %89 = arith.addf %85, %88 : vector<8x32xf32>
    %90 = arith.addf %89, %71 : vector<8x32xf32>
    %c0_59 = arith.constant 0 : index
    %c0_60 = arith.constant 0 : index
    %c0_61 = arith.constant 0 : index
    %91 = vector.load %arg14[%c0_59, %c0_60, %c0_61] : memref<2x1x32xf32, #tpu.memory_space<vmem>>, vector<1x1x32xf32>
    %92 = vector.shape_cast %91 : vector<1x1x32xf32> to vector<1x32xf32>
    %c0_62 = arith.constant 0 : index
    %c0_63 = arith.constant 0 : index
    %c0_64 = arith.constant 0 : index
    %93 = vector.load %arg15[%c0_62, %c0_63, %c0_64] : memref<2x1x32xf32, #tpu.memory_space<vmem>>, vector<1x1x32xf32>
    %94 = vector.shape_cast %93 : vector<1x1x32xf32> to vector<1x32xf32>
    %cst_65 = arith.constant dense<0.000000e+00> : vector<8xf32>
    %95 = vector.multi_reduction <add>, %90, %cst_65 [1] : vector<8x32xf32> to vector<8xf32>
    %96 = vector.shape_cast %95 : vector<8xf32> to vector<8x1xf32>
    %cst_66 = arith.constant 3.200000e+01 : f32
    %97 = vector.broadcast %cst_66 : f32 to vector<8x1xf32>
    %98 = arith.divf %96, %97 : vector<8x1xf32>
    %99 = vector.broadcast %98 : vector<8x1xf32> to vector<8x32xf32>
    %100 = arith.subf %90, %99 : vector<8x32xf32>
    %101 = arith.mulf %100, %100 : vector<8x32xf32>
    %cst_67 = arith.constant dense<0.000000e+00> : vector<8xf32>
    %102 = vector.multi_reduction <add>, %101, %cst_67 [1] : vector<8x32xf32> to vector<8xf32>
    %103 = vector.shape_cast %102 : vector<8xf32> to vector<8x1xf32>
    %cst_68 = arith.constant 3.200000e+01 : f32
    %104 = vector.broadcast %cst_68 : f32 to vector<8x1xf32>
    %105 = arith.divf %103, %104 : vector<8x1xf32>
    %106 = vector.broadcast %98 : vector<8x1xf32> to vector<8x32xf32>
    %107 = arith.subf %90, %106 : vector<8x32xf32>
    %cst_69 = arith.constant 9.99999974E-6 : f32
    %108 = vector.broadcast %cst_69 : f32 to vector<8x1xf32>
    %109 = arith.addf %105, %108 : vector<8x1xf32>
    %110 = math.rsqrt %109 : vector<8x1xf32>
    %111 = vector.broadcast %110 : vector<8x1xf32> to vector<8x32xf32>
    %112 = arith.mulf %107, %111 : vector<8x32xf32>
    %113 = vector.broadcast %92 : vector<1x32xf32> to vector<8x32xf32>
    %114 = arith.mulf %112, %113 : vector<8x32xf32>
    %115 = vector.broadcast %94 : vector<1x32xf32> to vector<8x32xf32>
    %116 = arith.addf %114, %115 : vector<8x32xf32>
    %117 = arith.truncf %116 : vector<8x32xf32> to vector<8x32xbf16>
    %118 = vector.shape_cast %117 : vector<8x32xbf16> to vector<1x8x32xbf16>
    %119 = vector.shape_cast %118 : vector<1x8x32xbf16> to vector<1x8x32xbf16>
    %120 = vector.broadcast %119 : vector<1x8x32xbf16> to vector<4x8x32xbf16>
    %c1 = arith.constant 1 : index
    %c0_70 = arith.constant 0 : index
    %c0_71 = arith.constant 0 : index
    %c0_72 = arith.constant 0 : index
    %121 = vector.load %arg3[%c1, %c0_70, %c0_71, %c0_72] : memref<2x4x32x8xbf16, #tpu.memory_space<vmem>>, vector<1x4x32x8xbf16>
    %122 = vector.shape_cast %121 : vector<1x4x32x8xbf16> to vector<4x32x8xbf16>
    "tpu.trace_start"() <{level = 10 : i32, message = "hle,hed->hld"}> : () -> ()
    %cst_73 = arith.constant dense<0.000000e+00> : vector<4x8x8xf32>
    %123 = tpu.matmul %120, %122, %cst_73 {dimension_numbers = #tpu.dot_dimension_numbers<[2], [1], [1], [2], [0, 0, 0, 1, 1, 2], [0], [0]>} : vector<4x8x32xbf16>, vector<4x32x8xbf16>, vector<4x8x8xf32> -> vector<4x8x8xf32>
    "tpu.trace_stop"() : () -> ()
    %c1_74 = arith.constant 1 : index
    %c0_75 = arith.constant 0 : index
    %c0_76 = arith.constant 0 : index
    %c0_77 = arith.constant 0 : index
    %124 = vector.load %arg4[%c1_74, %c0_75, %c0_76, %c0_77] : memref<2x4x32x8xbf16, #tpu.memory_space<vmem>>, vector<1x4x32x8xbf16>
    %125 = vector.shape_cast %124 : vector<1x4x32x8xbf16> to vector<4x32x8xbf16>
    "tpu.trace_start"() <{level = 10 : i32, message = "hle,hed->hld"}> : () -> ()
    %cst_78 = arith.constant dense<0.000000e+00> : vector<4x8x8xf32>
    %126 = tpu.matmul %120, %125, %cst_78 {dimension_numbers = #tpu.dot_dimension_numbers<[2], [1], [1], [2], [0, 0, 0, 1, 1, 2], [0], [0]>} : vector<4x8x32xbf16>, vector<4x32x8xbf16>, vector<4x8x8xf32> -> vector<4x8x8xf32>
    "tpu.trace_stop"() : () -> ()
    %c1_79 = arith.constant 1 : index
    %c0_80 = arith.constant 0 : index
    %c0_81 = arith.constant 0 : index
    %c0_82 = arith.constant 0 : index
    %127 = vector.load %arg5[%c1_79, %c0_80, %c0_81, %c0_82] : memref<2x4x32x8xbf16, #tpu.memory_space<vmem>>, vector<1x4x32x8xbf16>
    %128 = vector.shape_cast %127 : vector<1x4x32x8xbf16> to vector<4x32x8xbf16>
    "tpu.trace_start"() <{level = 10 : i32, message = "hle,hed->hld"}> : () -> ()
    %cst_83 = arith.constant dense<0.000000e+00> : vector<4x8x8xf32>
    %129 = tpu.matmul %120, %128, %cst_83 {dimension_numbers = #tpu.dot_dimension_numbers<[2], [1], [1], [2], [0, 0, 0, 1, 1, 2], [0], [0]>} : vector<4x8x32xbf16>, vector<4x32x8xbf16>, vector<4x8x8xf32> -> vector<4x8x8xf32>
    "tpu.trace_stop"() : () -> ()
    %cst_84 = arith.constant 0.353553385 : f32
    %130 = vector.broadcast %cst_84 : f32 to vector<4x8x8xf32>
    %131 = arith.mulf %123, %130 : vector<4x8x8xf32>
    %132 = arith.truncf %131 : vector<4x8x8xf32> to vector<4x8x8xbf16>
    %133 = arith.truncf %126 : vector<4x8x8xf32> to vector<4x8x8xbf16>
    "tpu.trace_start"() <{level = 10 : i32, message = "hqd,hkd->hqk"}> : () -> ()
    %cst_85 = arith.constant dense<0.000000e+00> : vector<4x8x8xf32>
    %134 = tpu.matmul %132, %133, %cst_85 {dimension_numbers = #tpu.dot_dimension_numbers<[2], [2], [1], [1], [0, 0, 0, 1, 1, 1], [0], [0]>} : vector<4x8x8xbf16>, vector<4x8x8xbf16>, vector<4x8x8xf32> -> vector<4x8x8xf32>
    "tpu.trace_stop"() : () -> ()
    %135 = vector.broadcast %2 : vector<1x1x8xf32> to vector<4x8x8xf32>
    %136 = arith.addf %134, %135 : vector<4x8x8xf32>
    %cst_86 = arith.constant dense<0xFF800000> : vector<4x8xf32>
    %137 = vector.multi_reduction <maximumf>, %136, %cst_86 [2] : vector<4x8x8xf32> to vector<4x8xf32>
    %138 = vector.shape_cast %137 : vector<4x8xf32> to vector<4x8x1xf32>
    %139 = vector.broadcast %138 : vector<4x8x1xf32> to vector<4x8x8xf32>
    %140 = arith.subf %136, %139 : vector<4x8x8xf32>
    %141 = math.exp %140 : vector<4x8x8xf32>
    %cst_87 = arith.constant dense<0.000000e+00> : vector<4x8xf32>
    %142 = vector.multi_reduction <add>, %141, %cst_87 [2] : vector<4x8x8xf32> to vector<4x8xf32>
    %143 = vector.shape_cast %142 : vector<4x8xf32> to vector<4x8x1xf32>
    %144 = tpu.reciprocal %143 {approx = true} : vector<4x8x1xf32> -> vector<4x8x1xf32>
    %145 = vector.broadcast %144 : vector<4x8x1xf32> to vector<4x8x8xf32>
    %146 = arith.mulf %141, %145 : vector<4x8x8xf32>
    %147 = arith.truncf %146 : vector<4x8x8xf32> to vector<4x8x8xbf16>
    %148 = arith.truncf %129 : vector<4x8x8xf32> to vector<4x8x8xbf16>
    "tpu.trace_start"() <{level = 10 : i32, message = "hqk,hkd->hqd"}> : () -> ()
    %cst_88 = arith.constant dense<0.000000e+00> : vector<4x8x8xf32>
    %149 = tpu.matmul %147, %148, %cst_88 {dimension_numbers = #tpu.dot_dimension_numbers<[2], [1], [1], [2], [0, 0, 0, 1, 1, 2], [0], [0]>} : vector<4x8x8xbf16>, vector<4x8x8xbf16>, vector<4x8x8xf32> -> vector<4x8x8xf32>
    "tpu.trace_stop"() : () -> ()
    %150 = arith.truncf %149 : vector<4x8x8xf32> to vector<4x8x8xbf16>
    %c1_89 = arith.constant 1 : index
    %c0_90 = arith.constant 0 : index
    %c0_91 = arith.constant 0 : index
    %c0_92 = arith.constant 0 : index
    %151 = vector.load %arg6[%c1_89, %c0_90, %c0_91, %c0_92] : memref<2x4x8x32xbf16, #tpu.memory_space<vmem>>, vector<1x4x8x32xbf16>
    %152 = vector.shape_cast %151 : vector<1x4x8x32xbf16> to vector<4x8x32xbf16>
    "tpu.trace_start"() <{level = 10 : i32, message = "hld,hde->hle"}> : () -> ()
    %cst_93 = arith.constant dense<0.000000e+00> : vector<4x8x32xf32>
    %153 = tpu.matmul %150, %152, %cst_93 {dimension_numbers = #tpu.dot_dimension_numbers<[2], [1], [1], [2], [0, 0, 0, 1, 1, 2], [0], [0]>} : vector<4x8x8xbf16>, vector<4x8x32xbf16>, vector<4x8x32xf32> -> vector<4x8x32xf32>
    "tpu.trace_stop"() : () -> ()
    %cst_94 = arith.constant dense<0.000000e+00> : vector<8x32xf32>
    %154 = vector.multi_reduction <add>, %153, %cst_94 [0] : vector<4x8x32xf32> to vector<8x32xf32>
    %c1_95 = arith.constant 1 : index
    %c0_96 = arith.constant 0 : index
    %c0_97 = arith.constant 0 : index
    %155 = vector.load %arg7[%c1_95, %c0_96, %c0_97] : memref<2x1x32xf32, #tpu.memory_space<vmem>>, vector<1x1x32xf32>
    %156 = vector.shape_cast %155 : vector<1x1x32xf32> to vector<1x32xf32>
    %157 = vector.broadcast %156 : vector<1x32xf32> to vector<8x32xf32>
    %158 = arith.addf %154, %157 : vector<8x32xf32>
    %159 = arith.addf %158, %116 : vector<8x32xf32>
    %c1_98 = arith.constant 1 : index
    %c0_99 = arith.constant 0 : index
    %c0_100 = arith.constant 0 : index
    %160 = vector.load %arg8[%c1_98, %c0_99, %c0_100] : memref<2x1x32xf32, #tpu.memory_space<vmem>>, vector<1x1x32xf32>
    %161 = vector.shape_cast %160 : vector<1x1x32xf32> to vector<1x32xf32>
    %c1_101 = arith.constant 1 : index
    %c0_102 = arith.constant 0 : index
    %c0_103 = arith.constant 0 : index
    %162 = vector.load %arg9[%c1_101, %c0_102, %c0_103] : memref<2x1x32xf32, #tpu.memory_space<vmem>>, vector<1x1x32xf32>
    %163 = vector.shape_cast %162 : vector<1x1x32xf32> to vector<1x32xf32>
    %cst_104 = arith.constant dense<0.000000e+00> : vector<8xf32>
    %164 = vector.multi_reduction <add>, %159, %cst_104 [1] : vector<8x32xf32> to vector<8xf32>
    %165 = vector.shape_cast %164 : vector<8xf32> to vector<8x1xf32>
    %cst_105 = arith.constant 3.200000e+01 : f32
    %166 = vector.broadcast %cst_105 : f32 to vector<8x1xf32>
    %167 = arith.divf %165, %166 : vector<8x1xf32>
    %168 = vector.broadcast %167 : vector<8x1xf32> to vector<8x32xf32>
    %169 = arith.subf %159, %168 : vector<8x32xf32>
    %170 = arith.mulf %169, %169 : vector<8x32xf32>
    %cst_106 = arith.constant dense<0.000000e+00> : vector<8xf32>
    %171 = vector.multi_reduction <add>, %170, %cst_106 [1] : vector<8x32xf32> to vector<8xf32>
    %172 = vector.shape_cast %171 : vector<8xf32> to vector<8x1xf32>
    %cst_107 = arith.constant 3.200000e+01 : f32
    %173 = vector.broadcast %cst_107 : f32 to vector<8x1xf32>
    %174 = arith.divf %172, %173 : vector<8x1xf32>
    %175 = vector.broadcast %167 : vector<8x1xf32> to vector<8x32xf32>
    %176 = arith.subf %159, %175 : vector<8x32xf32>
    %cst_108 = arith.constant 9.99999974E-6 : f32
    %177 = vector.broadcast %cst_108 : f32 to vector<8x1xf32>
    %178 = arith.addf %174, %177 : vector<8x1xf32>
    %179 = math.rsqrt %178 : vector<8x1xf32>
    %180 = vector.broadcast %179 : vector<8x1xf32> to vector<8x32xf32>
    %181 = arith.mulf %176, %180 : vector<8x32xf32>
    %182 = vector.broadcast %161 : vector<1x32xf32> to vector<8x32xf32>
    %183 = arith.mulf %181, %182 : vector<8x32xf32>
    %184 = vector.broadcast %163 : vector<1x32xf32> to vector<8x32xf32>
    %185 = arith.addf %183, %184 : vector<8x32xf32>
    %186 = arith.truncf %185 : vector<8x32xf32> to vector<8x32xbf16>
    %c1_109 = arith.constant 1 : index
    %c0_110 = arith.constant 0 : index
    %c0_111 = arith.constant 0 : index
    %187 = vector.load %arg10[%c1_109, %c0_110, %c0_111] : memref<2x32x128xbf16, #tpu.memory_space<vmem>>, vector<1x32x128xbf16>
    %188 = vector.shape_cast %187 : vector<1x32x128xbf16> to vector<32x128xbf16>
    %cst_112 = arith.constant dense<0.000000e+00> : vector<8x128xf32>
    %189 = tpu.matmul %186, %188, %cst_112 {dimension_numbers = #tpu.dot_dimension_numbers<[1], [0], [0], [1], [0, 0, 1, 1], [], []>} : vector<8x32xbf16>, vector<32x128xbf16>, vector<8x128xf32> -> vector<8x128xf32>
    %c1_113 = arith.constant 1 : index
    %c0_114 = arith.constant 0 : index
    %c0_115 = arith.constant 0 : index
    %190 = vector.load %arg11[%c1_113, %c0_114, %c0_115] : memref<2x1x128xf32, #tpu.memory_space<vmem>>, vector<1x1x128xf32>
    %191 = vector.shape_cast %190 : vector<1x1x128xf32> to vector<1x128xf32>
    %192 = vector.broadcast %191 : vector<1x128xf32> to vector<8x128xf32>
    %193 = arith.addf %189, %192 : vector<8x128xf32>
    %cst_116 = arith.constant 0.000000e+00 : f32
    %194 = vector.broadcast %cst_116 : f32 to vector<8x128xf32>
    %195 = arith.maximumf %193, %194 : vector<8x128xf32>
    %196 = arith.truncf %195 : vector<8x128xf32> to vector<8x128xbf16>
    %c1_117 = arith.constant 1 : index
    %c0_118 = arith.constant 0 : index
    %c0_119 = arith.constant 0 : index
    %197 = vector.load %arg12[%c1_117, %c0_118, %c0_119] : memref<2x128x32xbf16, #tpu.memory_space<vmem>>, vector<1x128x32xbf16>
    %198 = vector.shape_cast %197 : vector<1x128x32xbf16> to vector<128x32xbf16>
    %cst_120 = arith.constant dense<0.000000e+00> : vector<8x32xf32>
    %199 = tpu.matmul %196, %198, %cst_120 {dimension_numbers = #tpu.dot_dimension_numbers<[1], [0], [0], [1], [0, 0, 1, 1], [], []>} : vector<8x128xbf16>, vector<128x32xbf16>, vector<8x32xf32> -> vector<8x32xf32>
    %c1_121 = arith.constant 1 : index
    %c0_122 = arith.constant 0 : index
    %c0_123 = arith.constant 0 : index
    %200 = vector.load %arg13[%c1_121, %c0_122, %c0_123] : memref<2x1x32xf32, #tpu.memory_space<vmem>>, vector<1x1x32xf32>
    %201 = vector.shape_cast %200 : vector<1x1x32xf32> to vector<1x32xf32>
    %202 = vector.broadcast %201 : vector<1x32xf32> to vector<8x32xf32>
    %203 = arith.addf %199, %202 : vector<8x32xf32>
    %204 = arith.addf %203, %185 : vector<8x32xf32>
    %c1_124 = arith.constant 1 : index
    %c0_125 = arith.constant 0 : index
    %c0_126 = arith.constant 0 : index
    %205 = vector.load %arg14[%c1_124, %c0_125, %c0_126] : memref<2x1x32xf32, #tpu.memory_space<vmem>>, vector<1x1x32xf32>
    %206 = vector.shape_cast %205 : vector<1x1x32xf32> to vector<1x32xf32>
    %c1_127 = arith.constant 1 : index
    %c0_128 = arith.constant 0 : index
    %c0_129 = arith.constant 0 : index
    %207 = vector.load %arg15[%c1_127, %c0_128, %c0_129] : memref<2x1x32xf32, #tpu.memory_space<vmem>>, vector<1x1x32xf32>
    %208 = vector.shape_cast %207 : vector<1x1x32xf32> to vector<1x32xf32>
    %cst_130 = arith.constant dense<0.000000e+00> : vector<8xf32>
    %209 = vector.multi_reduction <add>, %204, %cst_130 [1] : vector<8x32xf32> to vector<8xf32>
    %210 = vector.shape_cast %209 : vector<8xf32> to vector<8x1xf32>
    %cst_131 = arith.constant 3.200000e+01 : f32
    %211 = vector.broadcast %cst_131 : f32 to vector<8x1xf32>
    %212 = arith.divf %210, %211 : vector<8x1xf32>
    %213 = vector.broadcast %212 : vector<8x1xf32> to vector<8x32xf32>
    %214 = arith.subf %204, %213 : vector<8x32xf32>
    %215 = arith.mulf %214, %214 : vector<8x32xf32>
    %cst_132 = arith.constant dense<0.000000e+00> : vector<8xf32>
    %216 = vector.multi_reduction <add>, %215, %cst_132 [1] : vector<8x32xf32> to vector<8xf32>
    %217 = vector.shape_cast %216 : vector<8xf32> to vector<8x1xf32>
    %cst_133 = arith.constant 3.200000e+01 : f32
    %218 = vector.broadcast %cst_133 : f32 to vector<8x1xf32>
    %219 = arith.divf %217, %218 : vector<8x1xf32>
    %220 = vector.broadcast %212 : vector<8x1xf32> to vector<8x32xf32>
    %221 = arith.subf %204, %220 : vector<8x32xf32>
    %cst_134 = arith.constant 9.99999974E-6 : f32
    %222 = vector.broadcast %cst_134 : f32 to vector<8x1xf32>
    %223 = arith.addf %219, %222 : vector<8x1xf32>
    %224 = math.rsqrt %223 : vector<8x1xf32>
    %225 = vector.broadcast %224 : vector<8x1xf32> to vector<8x32xf32>
    %226 = arith.mulf %221, %225 : vector<8x32xf32>
    %227 = vector.broadcast %206 : vector<1x32xf32> to vector<8x32xf32>
    %228 = arith.mulf %226, %227 : vector<8x32xf32>
    %229 = vector.broadcast %208 : vector<1x32xf32> to vector<8x32xf32>
    %230 = arith.addf %228, %229 : vector<8x32xf32>
    %231 = vector.shape_cast %230 : vector<8x32xf32> to vector<1x8x32xf32>
    %c0_135 = arith.constant 0 : index
    %c0_136 = arith.constant 0 : index
    %c0_137 = arith.constant 0 : index
    %232 = vector.load %arg16[%c0_135, %c0_136, %c0_137] : memref<1x8x32xf32, #tpu.memory_space<vmem>>, vector<1x8x32xf32>
    tpu.vector_store %arg16[%c0_135, %c0_136, %c0_137], %231 {strides = array<i32>} : memref<1x8x32xf32, #tpu.memory_space<vmem>>, vector<1x8x32xf32>,
    return
  }
  func.func @transform_0(%arg0: i32) -> (i32, i32, i32) {
    %c0_i32 = arith.constant 0 : i32
    %c0_i32_0 = arith.constant 0 : i32
    %c0_i32_1 = arith.constant 0 : i32
    return %arg0, %c0_i32, %c0_i32_0 : i32, i32, i32
  }
  func.func @transform_1(%arg0: i32) -> (i32, i32, i32) {
    %c0_i32 = arith.constant 0 : i32
    %c0_i32_0 = arith.constant 0 : i32
    %c0_i32_1 = arith.constant 0 : i32
    return %arg0, %c0_i32, %c0_i32_0 : i32, i32, i32
  }
  func.func @transform_2(%arg0: i32) -> (i32, i32, i32, i32) {
    %c0_i32 = arith.constant 0 : i32
    %c0_i32_0 = arith.constant 0 : i32
    %c0_i32_1 = arith.constant 0 : i32
    %c0_i32_2 = arith.constant 0 : i32
    %c0_i32_3 = arith.constant 0 : i32
    return %c0_i32, %c0_i32_0, %c0_i32_1, %c0_i32_2 : i32, i32, i32, i32
  }
  func.func @transform_3(%arg0: i32) -> (i32, i32, i32, i32) {
    %c0_i32 = arith.constant 0 : i32
    %c0_i32_0 = arith.constant 0 : i32
    %c0_i32_1 = arith.constant 0 : i32
    %c0_i32_2 = arith.constant 0 : i32
    %c0_i32_3 = arith.constant 0 : i32
    return %c0_i32, %c0_i32_0, %c0_i32_1, %c0_i32_2 : i32, i32, i32, i32
  }
  func.func @transform_4(%arg0: i32) -> (i32, i32, i32, i32) {
    %c0_i32 = arith.constant 0 : i32
    %c0_i32_0 = arith.constant 0 : i32
    %c0_i32_1 = arith.constant 0 : i32
    %c0_i32_2 = arith.constant 0 : i32
    %c0_i32_3 = arith.constant 0 : i32
    return %c0_i32, %c0_i32_0, %c0_i32_1, %c0_i32_2 : i32, i32, i32, i32
  }
  func.func @transform_5(%arg0: i32) -> (i32, i32, i32, i32) {
    %c0_i32 = arith.constant 0 : i32
    %c0_i32_0 = arith.constant 0 : i32
    %c0_i32_1 = arith.constant 0 : i32
    %c0_i32_2 = arith.constant 0 : i32
    %c0_i32_3 = arith.constant 0 : i32
    return %c0_i32, %c0_i32_0, %c0_i32_1, %c0_i32_2 : i32, i32, i32, i32
  }
  func.func @transform_6(%arg0: i32) -> (i32, i32, i32) {
    %c0_i32 = arith.constant 0 : i32
    %c0_i32_0 = arith.constant 0 : i32
    %c0_i32_1 = arith.constant 0 : i32
    %c0_i32_2 = arith.constant 0 : i32
    return %c0_i32, %c0_i32_0, %c0_i32_1 : i32, i32, i32
  }
  func.func @transform_7(%arg0: i32) -> (i32, i32, i32) {
    %c0_i32 = arith.constant 0 : i32
    %c0_i32_0 = arith.constant 0 : i32
    %c0_i32_1 = arith.constant 0 : i32
    %c0_i32_2 = arith.constant 0 : i32
    return %c0_i32, %c0_i32_0, %c0_i32_1 : i32, i32, i32
  }
  func.func @transform_8(%arg0: i32) -> (i32, i32, i32) {
    %c0_i32 = arith.constant 0 : i32
    %c0_i32_0 = arith.constant 0 : i32
    %c0_i32_1 = arith.constant 0 : i32
    %c0_i32_2 = arith.constant 0 : i32
    return %c0_i32, %c0_i32_0, %c0_i32_1 : i32, i32, i32
  }
  func.func @transform_9(%arg0: i32) -> (i32, i32, i32) {
    %c0_i32 = arith.constant 0 : i32
    %c0_i32_0 = arith.constant 0 : i32
    %c0_i32_1 = arith.constant 0 : i32
    %c0_i32_2 = arith.constant 0 : i32
    return %c0_i32, %c0_i32_0, %c0_i32_1 : i32, i32, i32
  }
  func.func @transform_10(%arg0: i32) -> (i32, i32, i32) {
    %c0_i32 = arith.constant 0 : i32
    %c0_i32_0 = arith.constant 0 : i32
    %c0_i32_1 = arith.constant 0 : i32
    %c0_i32_2 = arith.constant 0 : i32
    return %c0_i32, %c0_i32_0, %c0_i32_1 : i32, i32, i32
  }
  func.func @transform_11(%arg0: i32) -> (i32, i32, i32) {
    %c0_i32 = arith.constant 0 : i32
    %c0_i32_0 = arith.constant 0 : i32
    %c0_i32_1 = arith.constant 0 : i32
    %c0_i32_2 = arith.constant 0 : i32
    return %c0_i32, %c0_i32_0, %c0_i32_1 : i32, i32, i32
  }
  func.func @transform_12(%arg0: i32) -> (i32, i32, i32) {
    %c0_i32 = arith.constant 0 : i32
    %c0_i32_0 = arith.constant 0 : i32
    %c0_i32_1 = arith.constant 0 : i32
    %c0_i32_2 = arith.constant 0 : i32
    return %c0_i32, %c0_i32_0, %c0_i32_1 : i32, i32, i32
  }
  func.func @transform_13(%arg0: i32) -> (i32, i32, i32) {
    %c0_i32 = arith.constant 0 : i32
    %c0_i32_0 = arith.constant 0 : i32
    %c0_i32_1 = arith.constant 0 : i32
    %c0_i32_2 = arith.constant 0 : i32
    return %c0_i32, %c0_i32_0, %c0_i32_1 : i32, i32, i32
  }
  func.func @transform_14(%arg0: i32) -> (i32, i32, i32) {
    %c0_i32 = arith.constant 0 : i32
    %c0_i32_0 = arith.constant 0 : i32
    %c0_i32_1 = arith.constant 0 : i32
    %c0_i32_2 = arith.constant 0 : i32
    return %c0_i32, %c0_i32_0, %c0_i32_1 : i32, i32, i32
  }
  func.func @transform_15(%arg0: i32) -> (i32, i32, i32) {
    %c0_i32 = arith.constant 0 : i32
    %c0_i32_0 = arith.constant 0 : i32
    %c0_i32_1 = arith.constant 0 : i32
    return %arg0, %c0_i32, %c0_i32_0 : i32, i32, i32
  }
}

</mosaic_0001>

<bundles_post_ra>
// kernel: encoder_forward.1
= control target key start
LH: loop header
LB: loop body
LE: loop exit
PB: predicated region body
PF: predicated region fallthrough
CT: control target
= control target key end

     0   :  { %s5521_s0 = inlined_call_operand.vmem [shape: f32[2,8,32], index: 0, kind: input, shape index: {}]   ;;  %s5522_s1 = inlined_call_operand.vmem [shape: f32[2,1,8], index: 1, kind: input, shape index: {}]   ;;  %s5523_s2 = inlined_call_operand.vmem [shape: bf16[2,4,32,8], index: 2, kind: input, shape index: {}]   ;;  %s5524_s3 = inlined_call_operand.vmem [shape: bf16[2,4,32,8], index: 3, kind: input, shape index: {}]   ;;  %s5525_s4 = inlined_call_operand.vmem [shape: bf16[2,4,32,8], index: 4, kind: input, shape index: {}]   ;;  %s5526_s5 = inlined_call_operand.vmem [shape: bf16[2,4,8,32], index: 5, kind: input, shape index: {}]   ;;  %s5527_s6 = inlined_call_operand.vmem [shape: f32[2,1,32], index: 6, kind: input, shape index: {}]   ;;  %s5528_s7 = inlined_call_operand.vmem [shape: f32[2,1,32], index: 7, kind: input, shape index: {}]   ;;  %s5529_s8 = inlined_call_operand.vmem [shape: f32[2,1,32], index: 8, kind: input, shape index: {}]   ;;  %s5530_s9 = inlined_call_operand.vmem [shape: bf16[2,32,128], index: 9, kind: input, shape index: {}]   ;;  %s5531_s10 = inlined_call_operand.vmem [shape: f32[2,1,128], index: 10, kind: input, shape index: {}]   ;;  %s5532_s11 = inlined_call_operand.vmem [shape: bf16[2,128,32], index: 11, kind: input, shape index: {}]   ;;  %s5533_s12 = inlined_call_operand.vmem [shape: f32[2,1,32], index: 12, kind: input, shape index: {}]   ;;  %s5534_s13 = inlined_call_operand.vmem [shape: f32[2,1,32], index: 13, kind: input, shape index: {}]   ;;  %s5535_s14 = inlined_call_operand.vmem [shape: f32[2,1,32], index: 14, kind: input, shape index: {}]   ;;  %s5536_s15 = inlined_call_operand.hbm [shape: f32[2,8,32], index: 15, kind: output, shape index: {}]  }
   0x1   :  { %5540 = sst [smem:[#allocation8_spill]] %s5521_s0 }
   0x2   :  { %5541 = sst [smem:[#allocation9_spill]] %s5522_s1 }
   0x3   :  { %5542 = sst [smem:[#allocation10_spill]] %s5523_s2 }
   0x4   :  { %20 = vsyncpa [#allocation3], 0 }
   0x5   :  { %22 = vsyncpa [#allocation3 + $0x1], 0  ;;  %s4777_s18 = smov 0   ;;  %s4779_s19 = smov 0  }
   0x6   :  { %s4781_s20 = smov 0   ;;  %s4783_s21 = smov 0  }
   0x7 LB: > { %5543 = sst [smem:[#allocation5_spill]] %s4688_s20  ;;  %s4798_s22 = sadd.s32 4294967295, %s4692_s21   ;;  %s4692_s21 = sphi %s4783_s21, %s5551_s21   ;;  %s4688_s20 = sphi %s4781_s20, %s5553_s20   ;;  %s4684_s19 = sphi %s4779_s19, %s5555_s19   ;;  %s4680_s18 = sphi %s4777_s18, %s5554_s18  }
   0x8   : > { %s3723_s23 = sadd.s32 4294967294, %s4692_s21   ;;  %s4802_s24 = sadd.s32 1, %s4692_s21  }
   0x9   : > { %5544 = sst [smem:[#allocation6_spill]] %s4802_s24  ;;  %s360_s25 = sadd.s32 1, %s4688_s20 }
   0xa   : > { %s357_s26 = ssub.s32 %s4692_s21, %s4802_s24  ;;  %p370_p0 = scmp.ne.s32.totalorder %s4688_s20, %s4684_s19 }
   0xb   : > { %p358_p1 = scmp.eq.s32.totalorder %s357_s26, 0  ;;  %p371_p2 = scmp.eq.s32.totalorder %s4798_s22, 1 }
   0xc   : > { %p376_p3 = scmp.ne.s32.totalorder %s4684_s19, %s4680_s18  ;;  %p377_p4 = scmp.eq.s32.totalorder %s3723_s23, 1 }
   0xd   : > { %s4813_s27 = scalar_select %p358_p1, %s4688_s20, %s360_s25  }
   0xe   : > { %p4815_p5 = por %p371_p2, %p370_p0  ;;  %p4819_p6 = por %p377_p4, %p376_p3 }
   0xf   : > { %5545 = sst [smem:[#allocation7_spill]] %s4813_s27  ;;  %p3726_p7 = scmp.ge.s32.totalorder %s4692_s21, 1 }
  0x10   : > { %p447_p8 = scmp.lt.s32.totalorder %s4692_s21, 3 }
  0x12   : > { %p448_p9 = pnand %p3726_p7, %p447_p8 }
  0x13   : > { %s5548_s2 = sld [smem:[#allocation10_spill]] (!%p448_p9)  ;;  %v4694_v1 = vmov (!%p448_p9), 0.0   ;;  %v4523_v2 = vld [vmem:[%s5524_s3] sm:$0xff] (!%p448_p9)   ;;  %vm4695_vm0 = vmmov (!%p448_p9), 0   ;;  %p497_p10 = scmp.lt.s32.totalorder (!%p448_p9), %s4798_s22, 1  ;;  %v4525_v4 = vld [vmem:[%s5524_s3 + $0x8] sm:$0xff] (!%p448_p9)  }
  0x14   : > { %451 = sbr.rel (%p448_p9) target bundleno = 4624 (0x1210), region = 80  ;;  %4089 = vmatprep.subr.bf16.mxu1 (!%p448_p9), %v4694_v1  ;;  %4121 = vmatprep.subr.bf16.mxu0 (!%p448_p9), %v4694_v1  ;;  %s5549_s0 = sld [smem:[#allocation8_spill]] (!%p448_p9)  ;;  %v4527_v6 = vld [vmem:[%s5524_s3 + $0x20] sm:$0xff] (!%p448_p9)   ;;  %vm536_vm1 = vcmask (!%p448_p9), 261120   ;;  %v4529_v10 = vld [vmem:[%s5524_s3 + $0x28] sm:$0xff] (!%p448_p9)   ;;  %v4534_v19 = vld [vmem:[%s5524_s3 + $0x10] sm:$0xff] (!%p448_p9)  }
  0x15   : > { %4093 = vmatprep.mubr.msk.bf16.mxu1 (!%p448_p9), %vm4695_vm0, %v4694_v1  ;;  %4122 = vmatpush3.bf16.msra.mxu0 (!%p448_p9), %v4523_v2  ;;  %v4538_v12 = vld [vmem:[%s5525_s4] sm:$0xff] (!%p448_p9)   ;;  %v4539_v14 = vld [vmem:[%s5525_s4 + $0x8] sm:$0xff] (!%p448_p9)   ;;  %v4535_v20 = vld [vmem:[%s5524_s3 + $0x18] sm:$0xff] (!%p448_p9)   ;;  %vm1202_vm2 = vcmask (!%p448_p9), 64512   ;;  %vm1442_vm3 = vcmask (!%p448_p9), 1043456   ;;  %s5550_s1 = sld [smem:[#allocation9_spill]] (!%p448_p9) }
  0x16   : > { %4123 = vmatprep.subr.bf16.mxu0 (!%p448_p9), %v4694_v1  ;;  %4125 = vmatprep.mubr.msk.bf16.mxu0 (!%p448_p9), %vm4695_vm0, %v4694_v1  ;;  %v4540_v16 = vld [vmem:[%s5525_s4 + $0x20] sm:$0xff] (!%p448_p9)   ;;  %v4541_v18 = vld [vmem:[%s5525_s4 + $0x28] sm:$0xff] (!%p448_p9)   ;;  %v4536_v21 = vld [vmem:[%s5524_s3 + $0x30] sm:$0xff] (!%p448_p9)   ;;  %s494_s20 = sand.u32 (!%p448_p9), 1, %s4684_s19  }
  0x17   : > { %v4537_v22 = vld [vmem:[%s5524_s3 + $0x38] sm:$0xff] (!%p448_p9)   ;;  %v4542_v23 = vld [vmem:[%s5525_s4 + $0x10] sm:$0xff] (!%p448_p9)   ;;  %s3727_s27 = sshll.u32 (!%p448_p9), %s494_s20, 3  ;;  %s3642_s24 = scalar_lea.sflag (!%p448_p9), [#allocation3], %s494_s20 }
  0x18   : > { %v4543_v24 = vld [vmem:[%s5525_s4 + $0x18] sm:$0xff] (!%p448_p9)   ;;  %v4544_v25 = vld [vmem:[%s5525_s4 + $0x30] sm:$0xff] (!%p448_p9)  }
  0x19   : > { %v4522_v0 = vld [vmem:[%s5548_s2] sm:$0xff] (!%p448_p9)   ;;  %v4524_v3 = vld [vmem:[%s5548_s2 + $0x8] sm:$0xff] (!%p448_p9)   ;;  %v4526_v5 = vld [vmem:[%s5548_s2 + $0x10] sm:$0xff] (!%p448_p9)   ;;  %4124 = vmatpush3.bf16.msra.mxu0 (!%p448_p9), %v4525_v4 }
  0x1a   : > { %4090 = vmatpush3.bf16.msra.mxu1 (!%p448_p9), %v4522_v0  ;;  %4137 = vmatprep.subr.bf16.mxu0 (!%p448_p9), %v4694_v1  ;;  %v4528_v9 = vld [vmem:[%s5548_s2 + $0x18] sm:$0xff] (!%p448_p9)   ;;  %v4530_v11 = vld [vmem:[%s5548_s2 + $0x20] sm:$0xff] (!%p448_p9)   ;;  %v4531_v13 = vld [vmem:[%s5548_s2 + $0x28] sm:$0xff] (!%p448_p9)  }
  0x1b   : > { %4091 = vmatprep.subr.bf16.mxu1 %v4694_v1  ;;  %s4847_s17 = scalar_select %p497_p10, %s4798_s22, 1  ;;  %v4532_v15 = vld [vmem:[%s5548_s2 + $0x30] sm:$0xff]   ;;  %v4533_v17 = vld [vmem:[%s5548_s2 + $0x38] sm:$0xff]  }
  0x1c   : > { %v4545_v26 = vld [vmem:[%s5525_s4 + $0x38] sm:$0xff]  }
  0x1d   : > { %s3728_s23 = sshll.u32 %s4847_s17, 3 }
  0x1e   : > { %4092 = vmatpush3.bf16.msra.mxu1 %v4524_v3  ;;  %s500_s30 = scalar_lea.vmem %s5549_s0, %s3728_s23 }
  0x1f   : > { %4097 = vmatprep.subr.bf16.mxu1 %v4694_v1  ;;  %v4860_v7 = vld [vmem:[%s500_s30] sm:$0xff]  ;;  %s503_s30 = scalar_lea.vmem %s5550_s1, %s4847_s17  ;;  %s496_s17 = scalar_lea.vmem [#allocation2], %s3727_s27 }
  0x20   : > { %v4865_v8 = vpack.c.bf16 %v4860_v7, %v4860_v7  ;;  %s3655_s16 = sshll.u32 %s496_s17, 4  ;;  %s5480_s16 = int_to_ptr.vmem [resolvable:$true] %s3655_s16 }
  0x21   : > { %s4630_s23 = scalar_lea.vmem %s5480_s16, 128 }
  0x22   : > { %4094 = vmatmul.mubr.msk.bf16.vlgmr.msra.gmra.mrb[0].mxu1 %vm536_vm1, %v4865_v8  ;;  %4126 = vmatmul.mubr.msk.bf16.vlgmr.msra.gmra.mrb[0].mxu0 %vm536_vm1, %v4865_v8  ;;  %p4631_p11 = scmp.ne.s32.totalorder %s5480_s16, %s4630_s23 }
  0x23   : > { %4098 = vmatpush3.bf16.msra.mxu1 %v4526_v5  ;;  %4138 = vmatpush3.bf16.msra.mxu0 %v4527_v6 }
  0x24   : > { %4099 = vmatprep.subr.bf16.mxu1 %v4694_v1  ;;  %4139 = vmatprep.subr.bf16.mxu0 %v4694_v1  ;;  %p4632_p12 = pnand %p4631_p11, %p4815_p5 }
  0x25   : > { %4101 = vmatprep.mubr.msk.bf16.mxu1 %vm4695_vm0, %v4694_v1  ;;  %4141 = vmatprep.mubr.msk.bf16.mxu0 %vm4695_vm0, %v4694_v1 }
  0x26   : > { %p4633_p13 = pneg %p4632_p12 }
  0x27   : > { %4100 = vmatpush3.bf16.msra.mxu1 %v4528_v9  ;;  %4140 = vmatpush3.bf16.msra.mxu0 %v4529_v10 }
  0x28   : > { %4105 = vmatprep.subr.bf16.mxu1 %v4694_v1  ;;  %4153 = vmatprep.subr.bf16.mxu0 %v4694_v1 }
  0x2a   : > { %4102 = vmatmul.mubr.msk.bf16.vlgmr.msra.gmra.mrb[4].mxu1 %vm536_vm1, %v4865_v8  ;;  %4142 = vmatmul.mubr.msk.bf16.vlgmr.msra.gmra.mrb[4].mxu0 %vm536_vm1, %v4865_v8 }
  0x2b   : > { %4106 = vmatpush3.bf16.msra.mxu1 %v4530_v11  ;;  %4109 = vmatprep.mubr.msk.bf16.mxu1 %vm4695_vm0, %v4694_v1 }
  0x2c   : > { %4107 = vmatprep.subr.bf16.mxu1 %v4694_v1  ;;  %4154 = vmatpush3.bf16.msra.mxu0 %v4538_v12 }
  0x2d   : > { %4155 = vmatprep.subr.bf16.mxu0 %v4694_v1  ;;  %4157 = vmatprep.mubr.msk.bf16.mxu0 %vm4695_vm0, %v4694_v1 }
  0x2f   : > { %4108 = vmatpush3.bf16.msra.mxu1 %v4531_v13 }
  0x30   : > { %4113 = vmatprep.subr.bf16.mxu1 %v4694_v1  ;;  %4156 = vmatpush3.bf16.msra.mxu0 %v4539_v14 }
  0x31   : > { %4169 = vmatprep.subr.bf16.mxu0 %v4694_v1 }
  0x32   : > { %4110 = vmatmul.mubr.msk.bf16.vlgmr.msra.gmra.mrb[8].mxu1 %vm536_vm1, %v4865_v8 }
  0x33   : > { %4114 = vmatpush3.bf16.msra.mxu1 %v4532_v15  ;;  %4117 = vmatprep.mubr.msk.bf16.mxu1 %vm4695_vm0, %v4694_v1 }
  0x34   : > { %4115 = vmatprep.subr.bf16.mxu1 %v4694_v1  ;;  %4158 = vmatmul.mubr.msk.bf16.vlgmr.msra.gmra.mrb[8].mxu0 %vm536_vm1, %v4865_v8 }
  0x35   : > { %4170 = vmatpush3.bf16.msra.mxu0 %v4540_v16  ;;  %4173 = vmatprep.mubr.msk.bf16.mxu0 %vm4695_vm0, %v4694_v1 }
  0x36   : > { %4171 = vmatprep.subr.bf16.mxu0 %v4694_v1 }
  0x37   : > { %4116 = vmatpush3.bf16.msra.mxu1 %v4533_v17 }
  0x38   : > { %4129 = vmatprep.subr.bf16.mxu1 %v4694_v1 }
  0x39   : > { %4172 = vmatpush3.bf16.msra.mxu0 %v4541_v18 }
  0x3a   : > { %4118 = vmatmul.mubr.msk.bf16.vlgmr.msra.gmra.mrb[12].mxu1 %vm536_vm1, %v4865_v8  ;;  %4185 = vmatprep.subr.bf16.mxu0 %v4694_v1 }
  0x3b   : > { %4130 = vmatpush3.bf16.msra.mxu1 %v4534_v19  ;;  %4133 = vmatprep.mubr.msk.bf16.mxu1 %vm4695_vm0, %v4694_v1 }
  0x3c   : > { %4131 = vmatprep.subr.bf16.mxu1 %v4694_v1  ;;  %4174 = vmatmul.mubr.msk.bf16.vlgmr.msra.gmra.mrb[12].mxu0 %vm536_vm1, %v4865_v8 }
  0x3d   : > { %4187 = vmatprep.mubr.msk.bf16.mxu0 %vm4695_vm0, %v4694_v1 }
  0x3f   : > { %4132 = vmatpush3.bf16.msra.mxu1 %v4535_v20 }
  0x40   : > { %4145 = vmatprep.subr.bf16.mxu1 %v4694_v1 }
  0x42   : > { %4134 = vmatmul.mubr.msk.bf16.vlgmr.msra.gmra.mrb[16].mxu1 %vm536_vm1, %v4865_v8 }
  0x43   : > { %4146 = vmatpush3.bf16.msra.mxu1 %v4536_v21  ;;  %4149 = vmatprep.mubr.msk.bf16.mxu1 %vm4695_vm0, %v4694_v1 }
  0x44   : > { %4147 = vmatprep.subr.bf16.mxu1 %v4694_v1 }
  0x47   : > { %4148 = vmatpush3.bf16.msra.mxu1 %v4537_v22 }
  0x48   : > { %4161 = vmatprep.subr.bf16.mxu1 %v4694_v1 }
  0x4a   : > { %4150 = vmatmul.mubr.msk.bf16.vlgmr.msra.gmra.mrb[20].mxu1 %vm536_vm1, %v4865_v8 }
  0x4b   : > { %4165 = vmatprep.mubr.msk.bf16.mxu1 %vm4695_vm0, %v4694_v1  ;;  %4162 = vmatpush3.bf16.msra.mxu1 %v4542_v23 }
  0x4c   : > { %4163 = vmatprep.subr.bf16.mxu1 %v4694_v1 }
  0x4f   : > { %4164 = vmatpush3.bf16.msra.mxu1 %v4543_v24 }
  0x50   : > { %4177 = vmatprep.subr.bf16.mxu1 %v4694_v1 }
  0x52   : > { %4166 = vmatmul.mubr.msk.bf16.vlgmr.msra.gmra.mrb[24].mxu1 %vm536_vm1, %v4865_v8 }
  0x53   : > { %4181 = vmatprep.mubr.msk.bf16.mxu1 %vm4695_vm0, %v4694_v1  ;;  %4178 = vmatpush3.bf16.msra.mxu1 %v4544_v25 }
  0x54   : > { %4179 = vmatprep.subr.bf16.mxu1 %v4694_v1 }
  0x57   : > { %4180 = vmatpush3.bf16.msra.mxu1 %v4545_v26 }
  0x58   : > { %4191 = vmatprep.subr.bf16.mxu1 %v4694_v1 }
  0x5a   : > { %4182 = vmatmul.mubr.msk.bf16.vlgmr.msra.gmra.mrb[28].mxu1 %vm536_vm1, %v4865_v8 }
  0x5b   : > { %4193 = vmatprep.mubr.msk.bf16.mxu1 %vm4695_vm0, %v4694_v1 }
  0xf5   : > { %v574_v27 = vpop.f32.mrb[0].mxu1  ;;  %v798_v28 = vpop.f32.mrb[0].mxu0 }
  0xf6   : > { %v1192_v29 = vpack.c.bf16 %v798_v28, %v798_v28  ;;  %v4095_v30 = vpop.f32.mrb[1].mxu1  ;;  %v4127_v31 = vpop.f32.mrb[1].mxu0  ;;  %v1184_v37 = vmul.f32 0.35355338, %v574_v27 }
  0xf7   : > { %v577_v32 = vpop.f32.mrb[2].mxu1  ;;  %v801_v33 = vpop.f32.mrb[2].mxu0 }
  0xf8   : > { %v1207_v34 = vsel %vm1202_vm2, %v1192_v29, 0  ;;  %v4096_v35 = vpop.f32.mrb[3].mxu1  ;;  %v4128_v36 = vpop.f32.mrb[3].mxu0  ;;  %v1188_v40 = vpack.c.bf16 %v1184_v37, %v1184_v37  ;;  %v5021_v33 = vld [vmem:[%s503_s30] ss:$0 sm:$0xff]  ;;  %s3942_s30 = sshll.u32 %s4798_s22, 7 }
  0xf9   : > { %4186 = vmatpush3.bf16.xpose.msra.mxu0 %v1207_v34  ;;  %s4696_s22 = smov [#allocation2]  }
  0xfa   : > { %4197 = vmatprep.subr.bf16.mxu0 %v4694_v1  ;;  %s4634_s27 = sshll.u32 %s4696_s22, 4  ;;  %s4635_s27 = int_to_ptr.vmem [resolvable:$false] %s4634_s27 }
  0xfb   : > { %s4636_s25 = scalar_lea.vmem %s4635_s27, 256  ;;  %p4637_p0 = scmp.lt.s32.totalorder %s5480_s16, %s4635_s27 }
  0xfc   : > { %p4638_p1 = scmp.lt.s32.totalorder %s4636_s25, %s4630_s23 }
  0xfd   : > { %v626_v38 = vpop.f32.mrb[4].mxu1  ;;  %v902_v39 = vpop.f32.mrb[4].mxu0 }
  0xfe   : > { %v4103_v41 = vpop.f32.mrb[5].mxu1  ;;  %v1194_v42 = vpack.c.bf16 %v902_v39, %v902_v39  ;;  %v4143_v43 = vpop.f32.mrb[5].mxu0  ;;  %v1185_v13 = vmul.f32 0.35355338, %v626_v38  ;;  %p4639_p2 = por %p4638_p1, %p4637_p0 }
  0xff   : > { %v629_v44 = vpop.f32.mrb[6].mxu1  ;;  %v905_v45 = vpop.f32.mrb[6].mxu0 }
 0x100   : > { %v1299_v46 = vsel %vm1202_vm2, %v1194_v42, 0  ;;  %v4104_v47 = vpop.f32.mrb[7].mxu1  ;;  %4188 = vmatmul.mubr.msk.bf16.vlgmr.msra.gmra.mrb[16].mxu0 %vm1202_vm2, %v1188_v40  ;;  %v4144_v48 = vpop.f32.mrb[7].mxu0  ;;  %v1189_v15 = vpack.c.bf16 %v1185_v13, %v1185_v13  ;;  %p4640_p3 = pnand %p4639_p2, %p4633_p13 }
 0x101   : > { %4198 = vmatpush3.bf16.xpose.msra.mxu0 %v1299_v46  ;;  %4199 = vmatprep.mubr.msk.bf16.mxu0 %vm4695_vm0, %v4694_v1 }
 0x102   : > { %4209 = vmatprep.subr.bf16.mxu0 %v4694_v1 }
 0x105   : > { %v678_v49 = vpop.f32.mrb[8].mxu1 }
 0x106   : > { %v1186_v50 = vmul.f32 0.35355338, %v678_v49  ;;  %v4111_v51 = vpop.f32.mrb[9].mxu1 }
 0x107   : > { %v681_v52 = vpop.f32.mrb[10].mxu1  ;;  %v1022_v53 = vpop.f32.mrb[8].mxu0 }
 0x108   : > { %v1190_v54 = vpack.c.bf16 %v1186_v50, %v1186_v50  ;;  %v4112_v55 = vpop.f32.mrb[11].mxu1  ;;  %v1435_v56 = vpack.c.bf16 %v1022_v53, %v1022_v53  ;;  %v4159_v57 = vpop.f32.mrb[9].mxu0 }
 0x109   : > { %v1025_v58 = vpop.f32.mrb[10].mxu0 }
 0x10a   : > { %4200 = vmatmul.mubr.msk.bf16.vlgmr.msra.gmra.mrb[20].mxu0 %vm1202_vm2, %v1190_v54  ;;  %v1444_v59 = vsel %vm1442_vm3, %v1435_v56, 0  ;;  %v4160_v60 = vpop.f32.mrb[11].mxu0 }
 0x10b   : > { %4210 = vmatpush3.bf16.msra.mxu0 %v1444_v59  ;;  %4211 = vmatprep.mubr.msk.bf16.mxu0 %vm4695_vm0, %v4694_v1 }
 0x10c   : > { %4221 = vmatprep.subr.bf16.mxu0 %v4694_v1 }
 0x10d   : > { %v730_v61 = vpop.f32.mrb[12].mxu1 }
 0x10e   : > { %v4119_v62 = vpop.f32.mrb[13].mxu1  ;;  %v1187_v21 = vmul.f32 0.35355338, %v730_v61 }
 0x10f   : > { %v733_v63 = vpop.f32.mrb[14].mxu1  ;;  %v5001_v0 = vpop.f32.mrb[12].mxu0 }
 0x110   : > { %v4120_v2 = vpop.f32.mrb[15].mxu1  ;;  %v4175_v3 = vpop.f32.mrb[13].mxu0  ;;  %v1191_v22 = vpack.c.bf16 %v1187_v21, %v1187_v21 }
 0x111   : > { %v1129_v4 = vpop.f32.mrb[14].mxu0 }
 0x112   : > { %v4176_v5 = vpop.f32.mrb[15].mxu0 }
 0x115   : > { %v850_v6 = vpop.f32.mrb[16].mxu1 }
 0x116   : > { %v1193_v8 = vpack.c.bf16 %v850_v6, %v850_v6  ;;  %v4135_v9 = vpop.f32.mrb[17].mxu1 }
 0x117   : > { %v853_v10 = vpop.f32.mrb[18].mxu1 }
 0x118   : > { %v1253_v11 = vsel %vm1202_vm2, %v1193_v8, 0  ;;  %v4136_v12 = vpop.f32.mrb[19].mxu1 }
 0x119   : > { %4192 = vmatpush3.bf16.xpose.msra.mxu1 %v1253_v11 }
 0x11a   : > { %4203 = vmatprep.subr.bf16.mxu1 %v4694_v1 }
 0x11d   : > { %v954_v14 = vpop.f32.mrb[20].mxu1 }
 0x11e   : > { %v1195_v16 = vpack.c.bf16 %v954_v14, %v954_v14  ;;  %v4151_v17 = vpop.f32.mrb[21].mxu1 }
 0x11f   : > { %v957_v18 = vpop.f32.mrb[22].mxu1 }
 0x120   : > { %v1345_v19 = vsel %vm1202_vm2, %v1195_v16, 0  ;;  %v4152_v20 = vpop.f32.mrb[23].mxu1  ;;  %4194 = vmatmul.mubr.msk.bf16.vlgmr.msra.gmra.mrb[32].mxu1 %vm1202_vm2, %v1189_v15 }
 0x121   : > { %4204 = vmatpush3.bf16.xpose.msra.mxu1 %v1345_v19  ;;  %4205 = vmatprep.mubr.msk.bf16.mxu1 %vm4695_vm0, %v4694_v1  ;;  %v1437_v20 = vpack.c.bf16 %v5001_v0, %v5001_v0 }
 0x122   : > { %4215 = vmatprep.subr.bf16.mxu1 %v4694_v1 }
 0x125   : > { %v1074_v23 = vpop.f32.mrb[24].mxu1 }
 0x126   : > { %v1436_v24 = vpack.c.bf16 %v1074_v23, %v1074_v23  ;;  %v4167_v25 = vpop.f32.mrb[25].mxu1  ;;  %v1536_v23 = vsel %vm1442_vm3, %v1437_v20, 0 }
 0x127   : > { %v1077_v26 = vpop.f32.mrb[26].mxu1 }
 0x128   : > { %4206 = vmatmul.mubr.msk.bf16.vlgmr.msra.gmra.mrb[36].mxu1 %vm1202_vm2, %v1191_v22  ;;  %v1490_v27 = vsel %vm1442_vm3, %v1436_v24, 0  ;;  %v4168_v28 = vpop.f32.mrb[27].mxu1 }
 0x129   : > { %4217 = vmatprep.mubr.msk.bf16.mxu1 %vm4695_vm0, %v4694_v1  ;;  %4216 = vmatpush3.bf16.msra.mxu1 %v1490_v27 }
 0x12a   : > { %4227 = vmatprep.subr.bf16.mxu1 %v4694_v1 }
 0x12d   : > { %v5015_v29 = vpop.f32.mrb[28].mxu1 }
 0x12e   : > { %v4183_v30 = vpop.f32.mrb[29].mxu1 }
 0x12f   : > { %v1181_v31 = vpop.f32.mrb[30].mxu1  ;;  %v1438_v30 = vpack.c.bf16 %v5015_v29, %v5015_v29  ;;  %v1628_v29 = vld [vmem:[%s5526_s5] sm:$0xf] }
 0x130   : > { %v4184_v32 = vpop.f32.mrb[31].mxu1 }
 0x1d3   : > { %v1243_v34 = vpop.f32.mrb[16].mxu0 }
 0x1d4   : > { %v1244_v35 = vadd.f32 %v5021_v33, %v1243_v34  ;;  %v4189_v36 = vpop.f32.mrb[17].mxu0  ;;  %v1582_v34 = vsel %vm1442_vm3, %v1438_v30, 0 }
 0x1d5   : > { %v1246_v37 = vpop.f32.mrb[18].mxu0 }
 0x1d6   : > { %v4190_v38 = vpop.f32.mrb[19].mxu0  ;;  %v1387_v39 = vsel %vm1202_vm2, %v1244_v35, -inf }
 0x1d7   : > { %1388 = vmax.xlane.f32.xlu0 %v1387_v39  ;;  %v1636_v38 = vsel %vm1442_vm3, %v1628_v29, 0  ;;  %v1629_v39 = vld [vmem:[%s5526_s5 + $0x4] sm:$0xf]  ;;  %v4547_v29 = vld [vmem:[%s5530_s9 + $0x8] sm:$0xff]  }
 0x1dd   : > { %v1335_v40 = vpop.f32.mrb[20].mxu0 }
 0x1de   : > { %v1336_v41 = vadd.f32 %v5021_v33, %v1335_v40  ;;  %v4201_v42 = vpop.f32.mrb[21].mxu0  ;;  %v1682_v40 = vsel %vm1442_vm3, %v1629_v39, 0  ;;  %v4550_v39 = vld [vmem:[%s5532_s11 + $0x10] sm:$0xff]  }
 0x1df   : > { %v1338_v43 = vpop.f32.mrb[22].mxu0 }
 0x1e0   : > { %v4202_v44 = vpop.f32.mrb[23].mxu0  ;;  %v1393_v45 = vsel %vm1202_vm2, %v1336_v41, -inf }
 0x1e1   : > { %1394 = vmax.xlane.f32.xlu1 %v1393_v45 }
 0x1f3   : > { %v1289_v46 = vpop.f32.mrb[32].mxu1 }
 0x1f4   : > { %v1290_v47 = vadd.f32 %v5021_v33, %v1289_v46  ;;  %v4195_v48 = vpop.f32.mrb[33].mxu1 }
 0x1f5   : > { %v1292_v49 = vpop.f32.mrb[34].mxu1 }
 0x1f6   : > { %v4196_v50 = vpop.f32.mrb[35].mxu1  ;;  %v1390_v51 = vsel %vm1202_vm2, %v1290_v47, -inf }
 0x1f7   : > { %1391 = vmax.xlane.f32.xlu0 %v1390_v51 }
 0x1fb   : > { %v1381_v52 = vpop.f32.mrb[36].mxu1 }
 0x1fc   : > { %v1382_v53 = vadd.f32 %v5021_v33, %v1381_v52  ;;  %v4207_v54 = vpop.f32.mrb[37].mxu1 }
 0x1fd   : > { %v1384_v55 = vpop.f32.mrb[38].mxu1 }
 0x1fe   : > { %v4208_v56 = vpop.f32.mrb[39].mxu1  ;;  %v1396_v57 = vsel %vm1202_vm2, %v1382_v53, -inf }
 0x1ff   : > { %1397 = vmax.xlane.f32.xlu1 %v1396_v57 }
 0x264   : > { %v1389_v58 = vpop.xlane.xlu0 %1388 }
 0x265   : > { %v1399_v59 = vsub.f32 %v1244_v35, %v1389_v58 }
 0x267   : > { %v1403_v60 = vmul.f32 1.442695, %v1399_v59 }
 0x269   : > { %4590 = vpow2.f32 %v1403_v60 }
 0x26e   : > { %v1395_v61 = vpop.xlane.xlu1 %1394 }
 0x26f   : > { %v1401_v62 = vsub.f32 %v1336_v41, %v1395_v61  ;;  %v1630_v41 = vld [vmem:[%s5526_s5 + $0x8] sm:$0xf] }
 0x270   : > { %v1728_v45 = vsel %vm1442_vm3, %v1630_v41, 0  ;;  %v4552_v41 = vld [vmem:[%s5532_s11 + $0x20] sm:$0xff]  }
 0x271   : > { %v1407_v63 = vmul.f32 1.442695, %v1401_v62 }
 0x273   : > { %v4591_v2 = vpop.eup %4590  ;;  %4592 = vpow2.f32 %v1407_v63 }
 0x274   : > { %v1411_v3 = vsel %vm1202_vm2, %v4591_v2, 0.0 }
 0x275   : > { %1412 = vadd.xlane.f32.xlu0 %v1411_v3 }
 0x27d   : > { %v4593_v4 = vpop.eup %4592 }
 0x27e   : > { %v1417_v5 = vsel %vm1202_vm2, %v4593_v4, 0.0 }
 0x27f   : > { %1418 = vadd.xlane.f32.xlu0 %v1417_v5 }
 0x284   : > { %v1392_v6 = vpop.xlane.xlu0 %1391 }
 0x285   : > { %v1400_v8 = vsub.f32 %v1290_v47, %v1392_v6 }
 0x287   : > { %v1405_v9 = vmul.f32 1.442695, %v1400_v8 }
 0x289   : > { %4594 = vpow2.f32 %v1405_v9 }
 0x28c   : > { %v1398_v10 = vpop.xlane.xlu1 %1397 }
 0x28d   : > { %v1402_v11 = vsub.f32 %v1382_v53, %v1398_v10  ;;  %v1631_v53 = vld [vmem:[%s5526_s5 + $0xc] sm:$0xf] }
 0x28e   : > { %v1774_v57 = vsel %vm1442_vm3, %v1631_v53, 0  ;;  %v4554_v53 = vld [vmem:[%s5532_s11 + $0x30] sm:$0xff]  }
 0x28f   : > { %v1409_v12 = vmul.f32 1.442695, %v1402_v11 }
 0x291   : > { %4596 = vpow2.f32 %v1409_v12 }
 0x293   : > { %v4595_v13 = vpop.eup %4594 }
 0x294   : > { %v1414_v14 = vsel %vm1202_vm2, %v4595_v13, 0.0 }
 0x295   : > { %1415 = vadd.xlane.f32.xlu1 %v1414_v14 }
 0x29b   : > { %v4597_v15 = vpop.eup %4596 }
 0x29c   : > { %v1420_v16 = vsel %vm1202_vm2, %v4597_v15, 0.0 }
 0x29d   : > { %1421 = vadd.xlane.f32.xlu1 %v1420_v16 }
 0x302   : > { %v1413_v17 = vpop.xlane.xlu0 %1412 }
 0x303   : > { %4598 = vrcp.f32 %v1413_v17 }
 0x30c   : > { %v1419_v18 = vpop.xlane.xlu0 %1418 }
 0x30d   : > { %v4599_v19 = vpop.eup %4598  ;;  %4600 = vrcp.f32 %v1419_v18 }
 0x30e   : > { %v1427_v21 = vmul.f32 %v4599_v19, %v4591_v2 }
 0x310   : > { %v1431_v22 = vpack.c.bf16 %v1427_v21, %v1427_v21 }
 0x312   : > { %4212 = vmatmul.mubr.msk.bf16.vlgmr.msra.gmra.mrb[24].mxu0 %vm1202_vm2, %v1431_v22 }
 0x313   : > { %4222 = vmatpush3.bf16.msra.mxu0 %v1536_v23  ;;  %4223 = vmatprep.mubr.msk.bf16.mxu0 %vm4695_vm0, %v4694_v1  ;;  %v3778_v23 = vld [vmem:[%s5527_s6] ss:$0 sm:$0xff] }
 0x314   : > { %4233 = vmatprep.subr.bf16.mxu0 %v4694_v1 }
 0x317   : > { %v4601_v24 = vpop.eup %4600 }
 0x318   : > { %v1429_v25 = vmul.f32 %v4601_v24, %v4593_v4 }
 0x31a   : > { %v1433_v26 = vpack.c.bf16 %v1429_v25, %v1429_v25 }
 0x31c   : > { %4224 = vmatmul.mubr.msk.bf16.vlgmr.msra.gmra.mrb[28].mxu0 %vm1202_vm2, %v1433_v26 }
 0x31d   : > { %4235 = vmatprep.mubr.msk.bf16.mxu0 %vm4695_vm0, %v4694_v1  ;;  %4234 = vmatpush3.bf16.msra.mxu0 %v1636_v38  ;;  %v4549_v38 = vld [vmem:[%s5532_s11 + $0x8] sm:$0xff]  }
 0x31e   : > { %4245 = vmatprep.subr.bf16.mxu0 %v4694_v1 }
 0x322   : > { %v1416_v0 = vpop.xlane.xlu1 %1415 }
 0x323   : > { %4602 = vrcp.f32 %v1416_v0 }
 0x32a   : > { %v1422_v27 = vpop.xlane.xlu1 %1421 }
 0x32b   : > { %4604 = vrcp.f32 %v1422_v27 }
 0x32d   : > { %v4603_v28 = vpop.eup %4602 }
 0x32e   : > { %v1428_v31 = vmul.f32 %v4603_v28, %v4595_v13 }
 0x330   : > { %v1432_v32 = vpack.c.bf16 %v1428_v31, %v1428_v31 }
 0x332   : > { %4218 = vmatmul.mubr.msk.bf16.vlgmr.msra.gmra.mrb[40].mxu1 %vm1202_vm2, %v1432_v32 }
 0x333   : > { %4228 = vmatpush3.bf16.msra.mxu1 %v1582_v34  ;;  %4229 = vmatprep.mubr.msk.bf16.mxu1 %vm4695_vm0, %v4694_v1 }
 0x334   : > { %4239 = vmatprep.subr.bf16.mxu1 %v4694_v1 }
 0x335   : > { %v4605_v35 = vpop.eup %4604 }
 0x336   : > { %v1430_v36 = vmul.f32 %v4605_v35, %v4597_v15 }
 0x338   : > { %v1434_v37 = vpack.c.bf16 %v1430_v36, %v1430_v36 }
 0x33a   : > { %4230 = vmatmul.mubr.msk.bf16.vlgmr.msra.gmra.mrb[44].mxu1 %vm1202_vm2, %v1434_v37  ;;  %v4546_v37 = vld [vmem:[%s5530_s9] sm:$0xff]  }
 0x33b   : > { %4241 = vmatprep.mubr.msk.bf16.mxu1 %vm4695_vm0, %v4694_v1  ;;  %4240 = vmatpush3.bf16.msra.mxu1 %v1682_v40  ;;  %v4551_v40 = vld [vmem:[%s5532_s11 + $0x18] sm:$0xff]  }
 0x33c   : > { %4251 = vmatprep.subr.bf16.mxu1 %v4694_v1 }
 0x3e5   : > { %v1480_v42 = vpop.f32.mrb[24].mxu0 }
 0x3e6   : > { %v1624_v43 = vpack.c.bf16 %v1480_v42, %v1480_v42  ;;  %v4213_v44 = vpop.f32.mrb[25].mxu0  ;;  %v4553_v42 = vld [vmem:[%s5532_s11 + $0x28] sm:$0xff]  }
 0x3e7   : > { %v1483_v46 = vpop.f32.mrb[26].mxu0 }
 0x3e8   : > { %v4214_v47 = vpop.f32.mrb[27].mxu0  ;;  %4236 = vmatmul.mubr.msk.bf16.vlgmr.msra.gmra.mrb[32].mxu0 %vm1202_vm2, %v1624_v43 }
 0x3e9   : > { %4246 = vmatpush3.bf16.msra.mxu0 %v1728_v45  ;;  %4247 = vmatprep.mubr.msk.bf16.mxu0 %vm4695_vm0, %v4694_v1  ;;  %v3779_v47 = vld [vmem:[%s5528_s7] ss:$0 sm:$0xff] }
 0x3ea   : > { %4257 = vmatprep.subr.bf16.mxu0 %v4694_v1 }
 0x3ef   : > { %v1572_v48 = vpop.f32.mrb[28].mxu0 }
 0x3f0   : > { %v1626_v49 = vpack.c.bf16 %v1572_v48, %v1572_v48  ;;  %v4225_v50 = vpop.f32.mrb[29].mxu0 }
 0x3f1   : > { %v1575_v51 = vpop.f32.mrb[30].mxu0 }
 0x3f2   : > { %v4226_v52 = vpop.f32.mrb[31].mxu0  ;;  %4248 = vmatmul.mubr.msk.bf16.vlgmr.msra.gmra.mrb[36].mxu0 %vm1202_vm2, %v1626_v49  ;;  %v3780_v49 = vld [vmem:[%s5529_s8] ss:$0 sm:$0xff] }
 0x3f3   : > { %4261 = vmatprep.mubr.msk.bf16.mxu0 %vm4695_vm0, %v4694_v1  ;;  %4258 = vmatpush3.bf16.msra.mxu0 %v4546_v37  ;;  %v4567_v37 = vld [vmem:[%s5525_s4 + $0x48] sm:$0xff]  }
 0x3f4   : > { %4259 = vmatprep.subr.bf16.mxu0 %v4694_v1 }
 0x3f7   : > { %4260 = vmatpush3.bf16.msra.mxu0 %v4547_v29  ;;  %v4568_v29 = vld [vmem:[%s5548_s2 + $0x70] sm:$0xff]  }
 0x3f8   : > { %4285 = vmatprep.subr.bf16.mxu0 %v4694_v1 }
 0x405   : > { %v1526_v54 = vpop.f32.mrb[40].mxu1 }
 0x406   : > { %v1625_v55 = vpack.c.bf16 %v1526_v54, %v1526_v54  ;;  %v4219_v56 = vpop.f32.mrb[41].mxu1  ;;  %v4555_v54 = vld [vmem:[%s5532_s11 + $0x38] sm:$0xff]  }
 0x407   : > { %v1529_v58 = vpop.f32.mrb[42].mxu1 }
 0x408   : > { %v4220_v59 = vpop.f32.mrb[43].mxu1  ;;  %4242 = vmatmul.mubr.msk.bf16.vlgmr.msra.gmra.mrb[48].mxu1 %vm1202_vm2, %v1625_v55  ;;  %v3781_v55 = vld [vmem:[%s5531_s10] ss:$0 sm:$0xff] }
 0x409   : > { %4252 = vmatpush3.bf16.msra.mxu1 %v1774_v57  ;;  %4253 = vmatprep.mubr.msk.bf16.mxu1 %vm4695_vm0, %v4694_v1 }
 0x40a   : > { %4265 = vmatprep.subr.bf16.mxu1 %v4694_v1 }
 0x40d   : > { %v1618_v60 = vpop.f32.mrb[44].mxu1 }
 0x40e   : > { %v1627_v61 = vpack.c.bf16 %v1618_v60, %v1618_v60  ;;  %v4231_v62 = vpop.f32.mrb[45].mxu1 }
 0x40f   : > { %v1621_v63 = vpop.f32.mrb[46].mxu1 }
 0x410   : > { %v4232_v2 = vpop.f32.mrb[47].mxu1  ;;  %4254 = vmatmul.mubr.msk.bf16.vlgmr.msra.gmra.mrb[52].mxu1 %vm1202_vm2, %v1627_v61  ;;  %v3785_v63 = vld [vmem:[%s5533_s12] ss:$0 sm:$0xff] }
 0x411   : > { %4281 = vmatprep.mubr.msk.bf16.mxu1 %vm4695_vm0, %v4694_v1 }
 0x4bb   : > { %v1672_v3 = vpop.f32.mrb[32].mxu0 }
 0x4bc   : > { %v4237_v4 = vpop.f32.mrb[33].mxu0  ;;  %v1816_v13 = vsel %vm536_vm1, %v1672_v3, 0.0 }
 0x4bd   : > { %v1675_v5 = vpop.f32.mrb[34].mxu0 }
 0x4be   : > { %v4238_v6 = vpop.f32.mrb[35].mxu0 }
 0x4c5   : > { %v1764_v8 = vpop.f32.mrb[36].mxu0 }
 0x4c6   : > { %v4249_v9 = vpop.f32.mrb[37].mxu0  ;;  %v1819_v18 = vsel %vm536_vm1, %v1764_v8, 0.0 }
 0x4c7   : > { %v1767_v10 = vpop.f32.mrb[38].mxu0 }
 0x4c8   : > { %v4250_v11 = vpop.f32.mrb[39].mxu0 }
 0x4db   : > { %v1718_v12 = vpop.f32.mrb[48].mxu1 }
 0x4dc   : > { %v1817_v14 = vsel %vm536_vm1, %v1718_v12, 0.0  ;;  %v4243_v15 = vpop.f32.mrb[49].mxu1 }
 0x4dd   : > { %v1818_v16 = vadd.f32 %v1817_v14, %v1816_v13  ;;  %v1721_v17 = vpop.f32.mrb[50].mxu1  ;;  %v4556_v15 = vld [vmem:[%s5548_s2 + $0x40] sm:$0xff]  }
 0x4de   : > { %v4244_v19 = vpop.f32.mrb[51].mxu1  ;;  %v4558_v17 = vld [vmem:[%s5548_s2 + $0x48] sm:$0xff]  }
 0x4df   : > { %v1820_v20 = vadd.f32 %v1819_v18, %v1818_v16  ;;  %v4557_v16 = vld [vmem:[%s5524_s3 + $0x40] sm:$0xff]   ;;  %v4559_v18 = vld [vmem:[%s5524_s3 + $0x48] sm:$0xff]  }
 0x4e3   : > { %v1810_v21 = vpop.f32.mrb[52].mxu1 }
 0x4e4   : > { %v1821_v22 = vsel %vm536_vm1, %v1810_v21, 0.0  ;;  %v4255_v24 = vpop.f32.mrb[53].mxu1 }
 0x4e5   : > { %v1822_v25 = vadd.f32 %v1821_v22, %v1820_v20  ;;  %v1813_v26 = vpop.f32.mrb[54].mxu1 }
 0x4e6   : > { %v4256_v0 = vpop.f32.mrb[55].mxu1 }
 0x4e7   : > { %v1830_v27 = vadd.f32 %v3778_v23, %v1822_v25  ;;  %v3794_v23 = vld [vmem:[%s5534_s13] ss:$0 sm:$0xff] }
 0x4e8   : > { %v3795_v25 = vld [vmem:[%s5535_s14] ss:$0 sm:$0xff] }
 0x4e9   : > { %v1831_v28 = vadd.f32 %v1830_v27, %v4860_v7  ;;  %v4548_v7 = vld [vmem:[%s5532_s11] sm:$0xff]   ;;  %v4560_v27 = vld [vmem:[%s5548_s2 + $0x50] sm:$0xff]  }
 0x4ea   : > { %4266 = vmatpush3.bf16.msra.mxu1 %v4548_v7  ;;  %v4569_v7 = vld [vmem:[%s5525_s4 + $0x60] sm:$0xff]  }
 0x4eb   : > { %v1834_v30 = vsel %vm536_vm1, %v1831_v28, 0.0  ;;  %4267 = vmatprep.subr.bf16.mxu1 %v4694_v1 }
 0x4ec   : > { %1835 = vadd.xlane.f32.xlu0 %v1834_v30 }
 0x4ee   : > { %4268 = vmatpush3.bf16.msra.mxu1 %v4549_v38  ;;  %v4570_v38 = vld [vmem:[%s5548_s2 + $0x78] sm:$0xff]  }
 0x4ef   : > { %4269 = vmatprep.subr.bf16.mxu1 %v4694_v1 }
 0x4f2   : > { %4270 = vmatpush3.bf16.msra.mxu1 %v4550_v39  ;;  %v4571_v39 = vld [vmem:[%s5525_s4 + $0x68] sm:$0xff]  }
 0x4f3   : > { %4271 = vmatprep.subr.bf16.mxu1 %v4694_v1 }
 0x4f6   : > { %4272 = vmatpush3.bf16.msra.mxu1 %v4551_v40  ;;  %v4572_v40 = vld [vmem:[%s5524_s3 + $0x50] sm:$0xff]  }
 0x4f7   : > { %4273 = vmatprep.subr.bf16.mxu1 %v4694_v1 }
 0x4fa   : > { %4274 = vmatpush3.bf16.msra.mxu1 %v4552_v41  ;;  %v4573_v41 = vld [vmem:[%s5524_s3 + $0x58] sm:$0xff]  }
 0x4fb   : > { %4275 = vmatprep.subr.bf16.mxu1 %v4694_v1 }
 0x4fe   : > { %4276 = vmatpush3.bf16.msra.mxu1 %v4553_v42  ;;  %v4574_v42 = vld [vmem:[%s5524_s3 + $0x70] sm:$0xff]  }
 0x4ff   : > { %4277 = vmatprep.subr.bf16.mxu1 %v4694_v1 }
 0x502   : > { %4278 = vmatpush3.bf16.msra.mxu1 %v4554_v53 }
 0x503   : > { %4279 = vmatprep.subr.bf16.mxu1 %v4694_v1 }
 0x506   : > { %4280 = vmatpush3.bf16.msra.mxu1 %v4555_v54 }
 0x507   : > { %4317 = vmatprep.subr.bf16.mxu1 %v4694_v1 }
 0x579   : > { %v1836_v31 = vpop.xlane.xlu0 %1835 }
 0x57a   : > { %v1838_v32 = vmul.f32 0.03125, %v1836_v31  ;;  %v4562_v31 = vld [vmem:[%s5548_s2 + $0x58] sm:$0xff]  }
 0x57c   : > { %v1839_v34 = vsub.f32 %v1831_v28, %v1838_v32  ;;  %v4561_v28 = vld [vmem:[%s5524_s3 + $0x60] sm:$0xff]   ;;  %v4563_v32 = vld [vmem:[%s5524_s3 + $0x68] sm:$0xff]  }
 0x57e   : > { %v1840_v35 = vmul.f32 %v1839_v34, %v1839_v34 }
 0x580   : > { %v1841_v36 = vsel %vm536_vm1, %v1840_v35, 0.0  ;;  %v4565_v35 = vld [vmem:[%s5525_s4 + $0x40] sm:$0xff]  }
 0x581   : > { %1842 = vadd.xlane.f32.xlu1 %v1841_v36  ;;  %v4566_v36 = vld [vmem:[%s5548_s2 + $0x68] sm:$0xff]  }
 0x60e   : > { %v1843_v43 = vpop.xlane.xlu1 %1842 }
 0x60f   : > { %v1844_v44 = vmul.f32 0.03125, %v1843_v43  ;;  %v4575_v43 = vld [vmem:[%s5524_s3 + $0x78] sm:$0xff]  }
 0x611   : > { %v1845_v45 = vadd.f32 1e-05, %v1844_v44  ;;  %v4576_v44 = vld [vmem:[%s5525_s4 + $0x50] sm:$0xff]  }
 0x613   : > { %4606 = vrsqrt.f32 %v1845_v45  ;;  %v4577_v45 = vld [vmem:[%s5525_s4 + $0x58] sm:$0xff]  }
 0x61d   : > { %v4607_v46 = vpop.eup %4606 }
 0x61e   : > { %v1847_v48 = vmul.f32 %v4607_v46, %v1839_v34  ;;  %v4564_v34 = vld [vmem:[%s5548_s2 + $0x60] sm:$0xff]   ;;  %v4578_v46 = vld [vmem:[%s5525_s4 + $0x70] sm:$0xff]   ;;  %s5478_s2 = scalar_lea.hbm %s5536_s15, %s3942_s30 }
 0x620   : > { %v1854_v50 = vmul.f32 %v3779_v47, %v1847_v48  ;;  %v4579_v47 = vld [vmem:[%s5525_s4 + $0x78] sm:$0xff]  }
 0x622   : > { %v1861_v51 = vadd.f32 %v3780_v49, %v1854_v50 }
 0x624   : > { %v1862_v52 = vpack.c.bf16 %v1861_v51, %v1861_v51 }
 0x626   : > { %4262 = vmatmul.mubr.msk.bf16.vlgmr.msra.gmra.mrb[40].mxu0 %vm536_vm1, %v1862_v52 }
 0x627   : > { %4289 = vmatprep.mubr.msk.bf16.mxu0 %vm4695_vm0, %v4694_v1  ;;  %4286 = vmatpush3.bf16.msra.mxu0 %v4556_v15 }
 0x628   : > { %4287 = vmatprep.subr.bf16.mxu0 %v4694_v1 }
 0x62b   : > { %4288 = vmatpush3.bf16.msra.mxu0 %v4558_v17 }
 0x62c   : > { %4293 = vmatprep.subr.bf16.mxu0 %v4694_v1 }
 0x6f9   : > { %v1923_v56 = vpop.f32.mrb[40].mxu0 }
 0x6fa   : > { %v1924_v57 = vadd.f32 %v3781_v55, %v1923_v56  ;;  %v4263_v58 = vpop.f32.mrb[41].mxu0 }
 0x6fb   : > { %v1926_v59 = vpop.f32.mrb[42].mxu0 }
 0x6fc   : > { %v1929_v60 = vmax.f32 %v1924_v57, 0.0  ;;  %v4264_v61 = vpop.f32.mrb[43].mxu0 }
 0x6fe   : > { %v1930_v62 = vpack.c.bf16 %v1929_v60, %v1929_v60 }
 0x700   : > { %4282 = vmatmul.mubr.bf16.vlgmr.msra.gmra.mrb[56].mxu1 %v1930_v62 }
 0x701   : > { %4321 = vmatprep.mubr.msk.bf16.mxu1 %vm4695_vm0, %v4694_v1  ;;  %4318 = vmatpush3.bf16.msra.mxu1 %v4557_v16 }
 0x702   : > { %4319 = vmatprep.subr.bf16.mxu1 %v4694_v1 }
 0x705   : > { %4320 = vmatpush3.bf16.msra.mxu1 %v4559_v18 }
 0x706   : > { %4333 = vmatprep.subr.bf16.mxu1 %v4694_v1 }
 0x7d3   : > { %v2036_v2 = vpop.f32.mrb[56].mxu1 }
 0x7d4   : > { %v2037_v3 = vadd.f32 %v3785_v63, %v2036_v2  ;;  %v4283_v4 = vpop.f32.mrb[57].mxu1 }
 0x7d5   : > { %v2039_v5 = vpop.f32.mrb[58].mxu1 }
 0x7d6   : > { %v4284_v6 = vpop.f32.mrb[59].mxu1  ;;  %v2042_v8 = vadd.f32 %v2037_v3, %v1861_v51 }
 0x7d8   : > { %v2045_v9 = vsel %vm536_vm1, %v2042_v8, 0.0 }
 0x7d9   : > { %2046 = vadd.xlane.f32.xlu0 %v2045_v9 }
 0x866   : > { %v2047_v10 = vpop.xlane.xlu0 %2046 }
 0x867   : > { %v2048_v11 = vmul.f32 0.03125, %v2047_v10 }
 0x869   : > { %v2049_v12 = vsub.f32 %v2042_v8, %v2048_v11 }
 0x86b   : > { %v2050_v13 = vmul.f32 %v2049_v12, %v2049_v12 }
 0x86d   : > { %v2051_v14 = vsel %vm536_vm1, %v2050_v13, 0.0 }
 0x86e   : > { %2052 = vadd.xlane.f32.xlu1 %v2051_v14 }
 0x8fb   : > { %v2053_v19 = vpop.xlane.xlu1 %2052 }
 0x8fc   : > { %v2054_v20 = vmul.f32 0.03125, %v2053_v19 }
 0x8fe   : > { %v2055_v21 = vadd.f32 1e-05, %v2054_v20 }
 0x900   : > { %4608 = vrsqrt.f32 %v2055_v21 }
 0x90a   : > { %v4609_v22 = vpop.eup %4608 }
 0x90b   : > { %v2057_v24 = vmul.f32 %v4609_v22, %v2049_v12 }
 0x90d   : > { %v2064_v26 = vmul.f32 %v3794_v23, %v2057_v24 }
 0x90f   : > { %v5178_v0 = vadd.f32 %v3795_v25, %v2064_v26 }
 0x911   : > { %v5188_v30 = vpack.c.bf16 %v5178_v0, %v5178_v0 }
 0x913   : > { %4290 = vmatmul.mubr.msk.bf16.vlgmr.msra.gmra.mrb[44].mxu0 %vm536_vm1, %v5188_v30  ;;  %4322 = vmatmul.mubr.msk.bf16.vlgmr.msra.gmra.mrb[60].mxu1 %vm536_vm1, %v5188_v30 }
 0x914   : > { %4294 = vmatpush3.bf16.msra.mxu0 %v4560_v27  ;;  %4334 = vmatpush3.bf16.msra.mxu1 %v4561_v28 }
 0x915   : > { %4295 = vmatprep.subr.bf16.mxu0 %v4694_v1  ;;  %4335 = vmatprep.subr.bf16.mxu1 %v4694_v1 }
 0x916   : > { %4297 = vmatprep.mubr.msk.bf16.mxu0 %vm4695_vm0, %v4694_v1  ;;  %4337 = vmatprep.mubr.msk.bf16.mxu1 %vm4695_vm0, %v4694_v1 }
 0x918   : > { %4296 = vmatpush3.bf16.msra.mxu0 %v4562_v31  ;;  %4336 = vmatpush3.bf16.msra.mxu1 %v4563_v32 }
 0x919   : > { %4301 = vmatprep.subr.bf16.mxu0 %v4694_v1  ;;  %4349 = vmatprep.subr.bf16.mxu1 %v4694_v1 }
 0x91b   : > { %4298 = vmatmul.mubr.msk.bf16.vlgmr.msra.gmra.mrb[48].mxu0 %vm536_vm1, %v5188_v30  ;;  %4338 = vmatmul.mubr.msk.bf16.vlgmr.msra.gmra.mrb[64].mxu1 %vm536_vm1, %v5188_v30 }
 0x91c   : > { %4302 = vmatpush3.bf16.msra.mxu0 %v4564_v34  ;;  %4350 = vmatpush3.bf16.msra.mxu1 %v4565_v35 }
 0x91d   : > { %4303 = vmatprep.subr.bf16.mxu0 %v4694_v1  ;;  %4351 = vmatprep.subr.bf16.mxu1 %v4694_v1 }
 0x91e   : > { %4305 = vmatprep.mubr.msk.bf16.mxu0 %vm4695_vm0, %v4694_v1  ;;  %4353 = vmatprep.mubr.msk.bf16.mxu1 %vm4695_vm0, %v4694_v1 }
 0x920   : > { %4304 = vmatpush3.bf16.msra.mxu0 %v4566_v36  ;;  %4352 = vmatpush3.bf16.msra.mxu1 %v4567_v37 }
 0x921   : > { %4309 = vmatprep.subr.bf16.mxu0 %v4694_v1  ;;  %4365 = vmatprep.subr.bf16.mxu1 %v4694_v1 }
 0x923   : > { %4306 = vmatmul.mubr.msk.bf16.vlgmr.msra.gmra.mrb[52].mxu0 %vm536_vm1, %v5188_v30  ;;  %4354 = vmatmul.mubr.msk.bf16.vlgmr.msra.gmra.mrb[68].mxu1 %vm536_vm1, %v5188_v30 }
 0x924   : > { %4310 = vmatpush3.bf16.msra.mxu0 %v4568_v29  ;;  %4366 = vmatpush3.bf16.msra.mxu1 %v4569_v7 }
 0x925   : > { %4311 = vmatprep.subr.bf16.mxu0 %v4694_v1  ;;  %4367 = vmatprep.subr.bf16.mxu1 %v4694_v1 }
 0x926   : > { %4313 = vmatprep.mubr.msk.bf16.mxu0 %vm4695_vm0, %v4694_v1  ;;  %4369 = vmatprep.mubr.msk.bf16.mxu1 %vm4695_vm0, %v4694_v1 }
 0x928   : > { %4312 = vmatpush3.bf16.msra.mxu0 %v4570_v38  ;;  %4368 = vmatpush3.bf16.msra.mxu1 %v4571_v39 }
 0x929   : > { %4325 = vmatprep.subr.bf16.mxu0 %v4694_v1  ;;  %4381 = vmatprep.subr.bf16.mxu1 %v4694_v1 }
 0x92b   : > { %4314 = vmatmul.mubr.msk.bf16.vlgmr.msra.gmra.mrb[56].mxu0 %vm536_vm1, %v5188_v30  ;;  %4370 = vmatmul.mubr.msk.bf16.vlgmr.msra.gmra.mrb[72].mxu1 %vm536_vm1, %v5188_v30 }
 0x92c   : > { %4326 = vmatpush3.bf16.msra.mxu0 %v4572_v40  ;;  %4329 = vmatprep.mubr.msk.bf16.mxu0 %vm4695_vm0, %v4694_v1 }
 0x92d   : > { %4327 = vmatprep.subr.bf16.mxu0 %v4694_v1  ;;  %4383 = vmatprep.mubr.msk.bf16.mxu1 %vm4695_vm0, %v4694_v1 }
 0x930   : > { %4328 = vmatpush3.bf16.msra.mxu0 %v4573_v41 }
 0x931   : > { %4341 = vmatprep.subr.bf16.mxu0 %v4694_v1 }
 0x933   : > { %4330 = vmatmul.mubr.msk.bf16.vlgmr.msra.gmra.mrb[60].mxu0 %vm536_vm1, %v5188_v30 }
 0x934   : > { %4342 = vmatpush3.bf16.msra.mxu0 %v4574_v42  ;;  %4345 = vmatprep.mubr.msk.bf16.mxu0 %vm4695_vm0, %v4694_v1 }
 0x935   : > { %4343 = vmatprep.subr.bf16.mxu0 %v4694_v1 }
 0x938   : > { %4344 = vmatpush3.bf16.msra.mxu0 %v4575_v43 }
 0x939   : > { %4357 = vmatprep.subr.bf16.mxu0 %v4694_v1 }
 0x93b   : > { %4346 = vmatmul.mubr.msk.bf16.vlgmr.msra.gmra.mrb[64].mxu0 %vm536_vm1, %v5188_v30 }
 0x93c   : > { %4358 = vmatpush3.bf16.msra.mxu0 %v4576_v44  ;;  %4361 = vmatprep.mubr.msk.bf16.mxu0 %vm4695_vm0, %v4694_v1 }
 0x93d   : > { %4359 = vmatprep.subr.bf16.mxu0 %v4694_v1 }
 0x940   : > { %4360 = vmatpush3.bf16.msra.mxu0 %v4577_v45 }
 0x941   : > { %4373 = vmatprep.subr.bf16.mxu0 %v4694_v1 }
 0x943   : > { %4362 = vmatmul.mubr.msk.bf16.vlgmr.msra.gmra.mrb[68].mxu0 %vm536_vm1, %v5188_v30 }
 0x944   : > { %4374 = vmatpush3.bf16.msra.mxu0 %v4578_v46  ;;  %4377 = vmatprep.mubr.msk.bf16.mxu0 %vm4695_vm0, %v4694_v1 }
 0x945   : > { %4375 = vmatprep.subr.bf16.mxu0 %v4694_v1 }
 0x948   : > { %4376 = vmatpush3.bf16.msra.mxu0 %v4579_v47 }
 0x949   : > { %4387 = vmatprep.subr.bf16.mxu0 %v4694_v1 }
 0x94b   : > { %4378 = vmatmul.mubr.msk.bf16.vlgmr.msra.gmra.mrb[72].mxu0 %vm536_vm1, %v5188_v30 }
 0x94c   : > { %4389 = vmatprep.mubr.msk.bf16.mxu0 %vm4695_vm0, %v4694_v1 }
 0x9e6   : > { %v2139_v48 = vpop.f32.mrb[44].mxu0  ;;  %v2364_v49 = vpop.f32.mrb[60].mxu1 }
 0x9e7   : > { %v2759_v50 = vpack.c.bf16 %v2364_v49, %v2364_v49  ;;  %v4291_v51 = vpop.f32.mrb[45].mxu0  ;;  %v4323_v52 = vpop.f32.mrb[61].mxu1  ;;  %v2751_v58 = vmul.f32 0.35355338, %v2139_v48 }
 0x9e8   : > { %v2142_v53 = vpop.f32.mrb[46].mxu0  ;;  %v2367_v54 = vpop.f32.mrb[62].mxu1 }
 0x9e9   : > { %v2767_v55 = vsel %vm1202_vm2, %v2759_v50, 0  ;;  %v4292_v56 = vpop.f32.mrb[47].mxu0  ;;  %v4324_v57 = vpop.f32.mrb[63].mxu1  ;;  %v2755_v61 = vpack.c.bf16 %v2751_v58, %v2751_v58 }
 0x9ea   : > { %4382 = vmatpush3.bf16.xpose.msra.mxu1 %v2767_v55 }
 0x9eb   : > { %4393 = vmatprep.subr.bf16.mxu1 %v4694_v1 }
 0x9ee   : > { %v2191_v59 = vpop.f32.mrb[48].mxu0  ;;  %v2468_v60 = vpop.f32.mrb[64].mxu1 }
 0x9ef   : > { %v2761_v62 = vpack.c.bf16 %v2468_v60, %v2468_v60  ;;  %v4299_v63 = vpop.f32.mrb[49].mxu0  ;;  %v4339_v2 = vpop.f32.mrb[65].mxu1  ;;  %v2752_v37 = vmul.f32 0.35355338, %v2191_v59 }
 0x9f0   : > { %v2194_v3 = vpop.f32.mrb[50].mxu0  ;;  %v2471_v4 = vpop.f32.mrb[66].mxu1 }
 0x9f1   : > { %v2859_v5 = vsel %vm1202_vm2, %v2761_v62, 0  ;;  %v4300_v6 = vpop.f32.mrb[51].mxu0  ;;  %v4340_v8 = vpop.f32.mrb[67].mxu1  ;;  %4384 = vmatmul.mubr.msk.bf16.vlgmr.msra.gmra.mrb[76].mxu1 %vm1202_vm2, %v2755_v61  ;;  %v2756_v7 = vpack.c.bf16 %v2752_v37, %v2752_v37 }
 0x9f2   : > { %4394 = vmatpush3.bf16.xpose.msra.mxu1 %v2859_v5  ;;  %4395 = vmatprep.mubr.msk.bf16.mxu1 %vm4695_vm0, %v4694_v1 }
 0x9f3   : > { %4405 = vmatprep.subr.bf16.mxu1 %v4694_v1 }
 0x9f6   : > { %v2243_v9 = vpop.f32.mrb[52].mxu0  ;;  %v2589_v10 = vpop.f32.mrb[68].mxu1 }
 0x9f7   : > { %v2753_v11 = vmul.f32 0.35355338, %v2243_v9  ;;  %v2995_v12 = vpack.c.bf16 %v2589_v10, %v2589_v10  ;;  %v4307_v13 = vpop.f32.mrb[53].mxu0  ;;  %v4355_v14 = vpop.f32.mrb[69].mxu1 }
 0x9f8   : > { %v2246_v15 = vpop.f32.mrb[54].mxu0  ;;  %v2592_v16 = vpop.f32.mrb[70].mxu1 }
 0x9f9   : > { %v2757_v17 = vpack.c.bf16 %v2753_v11, %v2753_v11  ;;  %v3003_v18 = vsel %vm1442_vm3, %v2995_v12, 0  ;;  %v4308_v19 = vpop.f32.mrb[55].mxu0  ;;  %v4356_v20 = vpop.f32.mrb[71].mxu1 }
 0x9fb   : > { %4396 = vmatmul.mubr.msk.bf16.vlgmr.msra.gmra.mrb[80].mxu1 %vm1202_vm2, %v2757_v17 }
 0x9fc   : > { %4406 = vmatpush3.bf16.msra.mxu1 %v3003_v18  ;;  %4407 = vmatprep.mubr.msk.bf16.mxu1 %vm4695_vm0, %v4694_v1 }
 0x9fd   : > { %4417 = vmatprep.subr.bf16.mxu1 %v4694_v1 }
 0x9fe   : > { %v2295_v21 = vpop.f32.mrb[56].mxu0  ;;  %v5324_v22 = vpop.f32.mrb[72].mxu1 }
 0x9ff   : > { %v4315_v23 = vpop.f32.mrb[57].mxu0  ;;  %v4371_v24 = vpop.f32.mrb[73].mxu1  ;;  %v2754_v43 = vmul.f32 0.35355338, %v2295_v21 }
 0xa00   : > { %v2298_v25 = vpop.f32.mrb[58].mxu0  ;;  %v2696_v26 = vpop.f32.mrb[74].mxu1 }
 0xa01   : > { %v4316_v27 = vpop.f32.mrb[59].mxu0  ;;  %v4372_v28 = vpop.f32.mrb[75].mxu1  ;;  %v2758_v45 = vpack.c.bf16 %v2754_v43, %v2754_v43 }
 0xa06   : > { %v2416_v30 = vpop.f32.mrb[60].mxu0 }
 0xa07   : > { %v2760_v31 = vpack.c.bf16 %v2416_v30, %v2416_v30  ;;  %v4331_v32 = vpop.f32.mrb[61].mxu0 }
 0xa08   : > { %v2419_v34 = vpop.f32.mrb[62].mxu0 }
 0xa09   : > { %v2813_v35 = vsel %vm1202_vm2, %v2760_v31, 0  ;;  %v4332_v36 = vpop.f32.mrb[63].mxu0 }
 0xa0a   : > { %4388 = vmatpush3.bf16.xpose.msra.mxu0 %v2813_v35 }
 0xa0b   : > { %4399 = vmatprep.subr.bf16.mxu0 %v4694_v1 }
 0xa0e   : > { %v2520_v29 = vpop.f32.mrb[64].mxu0 }
 0xa0f   : > { %v2762_v38 = vpack.c.bf16 %v2520_v29, %v2520_v29  ;;  %v4347_v39 = vpop.f32.mrb[65].mxu0 }
 0xa10   : > { %v2523_v40 = vpop.f32.mrb[66].mxu0 }
 0xa11   : > { %v2905_v41 = vsel %vm1202_vm2, %v2762_v38, 0  ;;  %v4348_v42 = vpop.f32.mrb[67].mxu0  ;;  %4390 = vmatmul.mubr.msk.bf16.vlgmr.msra.gmra.mrb[76].mxu0 %vm1202_vm2, %v2756_v7 }
 0xa12   : > { %4400 = vmatpush3.bf16.xpose.msra.mxu0 %v2905_v41  ;;  %4401 = vmatprep.mubr.msk.bf16.mxu0 %vm4695_vm0, %v4694_v1  ;;  %v2997_v41 = vpack.c.bf16 %v5324_v22, %v5324_v22 }
 0xa13   : > { %4411 = vmatprep.subr.bf16.mxu0 %v4694_v1 }
 0xa16   : > { %v2641_v44 = vpop.f32.mrb[68].mxu0 }
 0xa17   : > { %v2996_v46 = vpack.c.bf16 %v2641_v44, %v2641_v44  ;;  %v4363_v47 = vpop.f32.mrb[69].mxu0  ;;  %v3095_v44 = vsel %vm1442_vm3, %v2997_v41, 0 }
 0xa18   : > { %v2644_v48 = vpop.f32.mrb[70].mxu0 }
 0xa19   : > { %v3049_v49 = vsel %vm1442_vm3, %v2996_v46, 0  ;;  %v4364_v50 = vpop.f32.mrb[71].mxu0  ;;  %4402 = vmatmul.mubr.msk.bf16.vlgmr.msra.gmra.mrb[80].mxu0 %vm1202_vm2, %v2758_v45 }
 0xa1a   : > { %4412 = vmatpush3.bf16.msra.mxu0 %v3049_v49  ;;  %4413 = vmatprep.mubr.msk.bf16.mxu0 %vm4695_vm0, %v4694_v1 }
 0xa1b   : > { %4423 = vmatprep.subr.bf16.mxu0 %v4694_v1 }
 0xa1e   : > { %v5338_v51 = vpop.f32.mrb[72].mxu0 }
 0xa1f   : > { %v4379_v52 = vpop.f32.mrb[73].mxu0  ;;  %v2998_v50 = vpack.c.bf16 %v5338_v51, %v5338_v51  ;;  %v3888_v51 = vld [vmem:[%s5526_s5 + $0x10] sm:$0xf] }
 0xa20   : > { %v2748_v53 = vpop.f32.mrb[74].mxu0 }
 0xa21   : > { %v4380_v54 = vpop.f32.mrb[75].mxu0 }
 0xa22   : > { %v3141_v54 = vsel %vm1442_vm3, %v2998_v50, 0 }
 0xac4   : > { %v2803_v55 = vpop.f32.mrb[76].mxu1 }
 0xac5   : > { %v2804_v56 = vadd.f32 %v5021_v33, %v2803_v55  ;;  %v4385_v57 = vpop.f32.mrb[77].mxu1 }
 0xac6   : > { %v2806_v58 = vpop.f32.mrb[78].mxu1 }
 0xac7   : > { %v4386_v59 = vpop.f32.mrb[79].mxu1  ;;  %v2947_v60 = vsel %vm1202_vm2, %v2804_v56, -inf  ;;  %v3196_v58 = vsel %vm1442_vm3, %v3888_v51, 0  ;;  %v4583_v51 = vld [vmem:[%s5532_s11 + $0x48] sm:$0xff]  }
 0xac8   : > { %2948 = vmax.xlane.f32.xlu0 %v2947_v60  ;;  %v3889_v59 = vld [vmem:[%s5526_s5 + $0x14] sm:$0xf] }
 0xac9   : > { %v3242_v60 = vsel %vm1442_vm3, %v3889_v59, 0  ;;  %v4585_v59 = vld [vmem:[%s5532_s11 + $0x58] sm:$0xff]  }
 0xace   : > { %v2895_v61 = vpop.f32.mrb[80].mxu1 }
 0xacf   : > { %v2896_v62 = vadd.f32 %v5021_v33, %v2895_v61  ;;  %v4397_v63 = vpop.f32.mrb[81].mxu1  ;;  %v3890_v61 = vld [vmem:[%s5526_s5 + $0x18] sm:$0xf] }
 0xad0   : > { %v2898_v2 = vpop.f32.mrb[82].mxu1 }
 0xad1   : > { %v4398_v3 = vpop.f32.mrb[83].mxu1  ;;  %v2953_v4 = vsel %vm1202_vm2, %v2896_v62, -inf }
 0xad2   : > { %2954 = vmax.xlane.f32.xlu0 %v2953_v4  ;;  %v3288_v3 = vsel %vm1442_vm3, %v3890_v61, 0  ;;  %v4587_v61 = vld [vmem:[%s5532_s11 + $0x68] sm:$0xff]  }
 0xae4   : > { %v2849_v5 = vpop.f32.mrb[76].mxu0 }
 0xae5   : > { %v2850_v6 = vadd.f32 %v5021_v33, %v2849_v5  ;;  %v4391_v8 = vpop.f32.mrb[77].mxu0 }
 0xae6   : > { %v2852_v9 = vpop.f32.mrb[78].mxu0 }
 0xae7   : > { %v4392_v10 = vpop.f32.mrb[79].mxu0  ;;  %v2950_v11 = vsel %vm1202_vm2, %v2850_v6, -inf }
 0xae8   : > { %2951 = vmax.xlane.f32.xlu1 %v2950_v11 }
 0xaec   : > { %v2941_v12 = vpop.f32.mrb[80].mxu0 }
 0xaed   : > { %v2942_v13 = vadd.f32 %v5021_v33, %v2941_v12  ;;  %v4403_v14 = vpop.f32.mrb[81].mxu0  ;;  %v3891_v12 = vld [vmem:[%s5526_s5 + $0x1c] sm:$0xf] }
 0xaee   : > { %v2944_v15 = vpop.f32.mrb[82].mxu0 }
 0xaef   : > { %v4404_v16 = vpop.f32.mrb[83].mxu0  ;;  %v2956_v17 = vsel %vm1202_vm2, %v2942_v13, -inf }
 0xaf0   : > { %2957 = vmax.xlane.f32.xlu1 %v2956_v17  ;;  %v3334_v16 = vsel %vm1442_vm3, %v3891_v12, 0  ;;  %v4589_v12 = vld [vmem:[%s5532_s11 + $0x78] sm:$0xff]  }
 0xb55   : > { %v2949_v18 = vpop.xlane.xlu0 %2948 }
 0xb56   : > { %v2959_v19 = vsub.f32 %v2804_v56, %v2949_v18 }
 0xb58   : > { %v2963_v20 = vmul.f32 1.442695, %v2959_v19 }
 0xb5a   : > { %4610 = vpow2.f32 %v2963_v20 }
 0xb5f   : > { %v2955_v21 = vpop.xlane.xlu0 %2954 }
 0xb60   : > { %v2961_v23 = vsub.f32 %v2896_v62, %v2955_v21 }
 0xb62   : > { %v2967_v24 = vmul.f32 1.442695, %v2961_v23 }
 0xb64   : > { %v4611_v25 = vpop.eup %4610  ;;  %4612 = vpow2.f32 %v2967_v24 }
 0xb65   : > { %v2971_v26 = vsel %vm1202_vm2, %v4611_v25, 0.0 }
 0xb66   : > { %2972 = vadd.xlane.f32.xlu0 %v2971_v26 }
 0xb6e   : > { %v4613_v27 = vpop.eup %4612 }
 0xb6f   : > { %v2977_v33 = vsel %vm1202_vm2, %v4613_v27, 0.0 }
 0xb70   : > { %2978 = vadd.xlane.f32.xlu0 %v2977_v33 }
 0xb75   : > { %v2952_v28 = vpop.xlane.xlu1 %2951 }
 0xb76   : > { %v2960_v30 = vsub.f32 %v2850_v6, %v2952_v28 }
 0xb78   : > { %v2965_v31 = vmul.f32 1.442695, %v2960_v30 }
 0xb7a   : > { %4614 = vpow2.f32 %v2965_v31 }
 0xb7d   : > { %v2958_v32 = vpop.xlane.xlu1 %2957 }
 0xb7e   : > { %v2962_v34 = vsub.f32 %v2942_v13, %v2958_v32 }
 0xb80   : > { %v2969_v35 = vmul.f32 1.442695, %v2962_v34 }
 0xb82   : > { %4616 = vpow2.f32 %v2969_v35 }
 0xb84   : > { %v4615_v36 = vpop.eup %4614 }
 0xb85   : > { %v2974_v37 = vsel %vm1202_vm2, %v4615_v36, 0.0 }
 0xb86   : > { %2975 = vadd.xlane.f32.xlu1 %v2974_v37 }
 0xb8c   : > { %v4617_v29 = vpop.eup %4616 }
 0xb8d   : > { %v2980_v7 = vsel %vm1202_vm2, %v4617_v29, 0.0 }
 0xb8e   : > { %2981 = vadd.xlane.f32.xlu1 %v2980_v7 }
 0xbf3   : > { %v2973_v38 = vpop.xlane.xlu0 %2972 }
 0xbf4   : > { %4618 = vrcp.f32 %v2973_v38 }
 0xbfd   : > { %v2979_v39 = vpop.xlane.xlu0 %2978 }
 0xbfe   : > { %v4619_v40 = vpop.eup %4618  ;;  %4620 = vrcp.f32 %v2979_v39 }
 0xbff   : > { %v2987_v42 = vmul.f32 %v4619_v40, %v4611_v25 }
 0xc01   : > { %v2991_v43 = vpack.c.bf16 %v2987_v42, %v2987_v42 }
 0xc03   : > { %4408 = vmatmul.mubr.msk.bf16.vlgmr.msra.gmra.mrb[84].mxu1 %vm1202_vm2, %v2991_v43  ;;  %v3897_v43 = vld [vmem:[%s5527_s6 + $0x1] ss:$0 sm:$0xff] }
 0xc04   : > { %4418 = vmatpush3.bf16.msra.mxu1 %v3095_v44  ;;  %4419 = vmatprep.mubr.msk.bf16.mxu1 %vm4695_vm0, %v4694_v1 }
 0xc05   : > { %4429 = vmatprep.subr.bf16.mxu1 %v4694_v1 }
 0xc08   : > { %v4621_v45 = vpop.eup %4620 }
 0xc09   : > { %v2989_v46 = vmul.f32 %v4621_v45, %v4613_v27 }
 0xc0b   : > { %v2993_v47 = vpack.c.bf16 %v2989_v46, %v2989_v46 }
 0xc0d   : > { %4420 = vmatmul.mubr.msk.bf16.vlgmr.msra.gmra.mrb[88].mxu1 %vm1202_vm2, %v2993_v47 }
 0xc0e   : > { %4431 = vmatprep.mubr.msk.bf16.mxu1 %vm4695_vm0, %v4694_v1  ;;  %4430 = vmatpush3.bf16.msra.mxu1 %v3196_v58  ;;  %v4584_v58 = vld [vmem:[%s5532_s11 + $0x50] sm:$0xff]  }
 0xc0f   : > { %4441 = vmatprep.subr.bf16.mxu1 %v4694_v1 }
 0xc13   : > { %v2976_v22 = vpop.xlane.xlu1 %2975 }
 0xc14   : > { %4622 = vrcp.f32 %v2976_v22 }
 0xc1b   : > { %v2982_v48 = vpop.xlane.xlu1 %2981 }
 0xc1c   : > { %4624 = vrcp.f32 %v2982_v48 }
 0xc1e   : > { %v4623_v49 = vpop.eup %4622 }
 0xc1f   : > { %v2988_v52 = vmul.f32 %v4623_v49, %v4615_v36 }
 0xc21   : > { %v2992_v53 = vpack.c.bf16 %v2988_v52, %v2988_v52 }
 0xc23   : > { %4414 = vmatmul.mubr.msk.bf16.vlgmr.msra.gmra.mrb[84].mxu0 %vm1202_vm2, %v2992_v53 }
 0xc24   : > { %4424 = vmatpush3.bf16.msra.mxu0 %v3141_v54  ;;  %4425 = vmatprep.mubr.msk.bf16.mxu0 %vm4695_vm0, %v4694_v1 }
 0xc25   : > { %4435 = vmatprep.subr.bf16.mxu0 %v4694_v1 }
 0xc26   : > { %v4625_v55 = vpop.eup %4624 }
 0xc27   : > { %v2990_v56 = vmul.f32 %v4625_v55, %v4617_v29 }
 0xc29   : > { %v2994_v57 = vpack.c.bf16 %v2990_v56, %v2990_v56  ;;  %v4580_v56 = vld [vmem:[%s5530_s9 + $0x10] sm:$0xff]  }
 0xc2b   : > { %4426 = vmatmul.mubr.msk.bf16.vlgmr.msra.gmra.mrb[88].mxu0 %vm1202_vm2, %v2994_v57  ;;  %v4581_v57 = vld [vmem:[%s5530_s9 + $0x18] sm:$0xff]  }
 0xc2c   : > { %4437 = vmatprep.mubr.msk.bf16.mxu0 %vm4695_vm0, %v4694_v1  ;;  %4436 = vmatpush3.bf16.msra.mxu0 %v3242_v60  ;;  %v4586_v60 = vld [vmem:[%s5532_s11 + $0x60] sm:$0xff]  }
 0xc2d   : > { %4447 = vmatprep.subr.bf16.mxu0 %v4694_v1 }
 0xcd6   : > { %v3039_v62 = vpop.f32.mrb[84].mxu1 }
 0xcd7   : > { %v3183_v63 = vpack.c.bf16 %v3039_v62, %v3039_v62  ;;  %v4409_v2 = vpop.f32.mrb[85].mxu1 }
 0xcd8   : > { %v3042_v4 = vpop.f32.mrb[86].mxu1 }
 0xcd9   : > { %v4410_v5 = vpop.f32.mrb[87].mxu1  ;;  %4432 = vmatmul.mubr.msk.bf16.vlgmr.msra.gmra.mrb[92].mxu1 %vm1202_vm2, %v3183_v63  ;;  %v3900_v4 = vld [vmem:[%s5528_s7 + $0x1] ss:$0 sm:$0xff] }
 0xcda   : > { %4442 = vmatpush3.bf16.msra.mxu1 %v3288_v3  ;;  %4443 = vmatprep.mubr.msk.bf16.mxu1 %vm4695_vm0, %v4694_v1 }
 0xcdb   : > { %4453 = vmatprep.subr.bf16.mxu1 %v4694_v1 }
 0xce0   : > { %v3131_v6 = vpop.f32.mrb[88].mxu1 }
 0xce1   : > { %v3185_v8 = vpack.c.bf16 %v3131_v6, %v3131_v6  ;;  %v4421_v9 = vpop.f32.mrb[89].mxu1  ;;  %v3901_v6 = vld [vmem:[%s5529_s8 + $0x1] ss:$0 sm:$0xff] }
 0xce2   : > { %v3134_v10 = vpop.f32.mrb[90].mxu1 }
 0xce3   : > { %v4422_v11 = vpop.f32.mrb[91].mxu1  ;;  %4444 = vmatmul.mubr.msk.bf16.vlgmr.msra.gmra.mrb[96].mxu1 %vm1202_vm2, %v3185_v8 }
 0xce4   : > { %4457 = vmatprep.mubr.msk.bf16.mxu1 %vm4695_vm0, %v4694_v1  ;;  %4454 = vmatpush3.bf16.msra.mxu1 %v4580_v56  ;;  %v4588_v11 = vld [vmem:[%s5532_s11 + $0x70] sm:$0xff]  }
 0xce5   : > { %4455 = vmatprep.subr.bf16.mxu1 %v4694_v1 }
 0xce8   : > { %4456 = vmatpush3.bf16.msra.mxu1 %v4581_v57 }
 0xcf6   : > { %v3085_v13 = vpop.f32.mrb[84].mxu0 }
 0xcf7   : > { %v3184_v14 = vpack.c.bf16 %v3085_v13, %v3085_v13  ;;  %v4415_v15 = vpop.f32.mrb[85].mxu0  ;;  %v3907_v13 = vld [vmem:[%s5531_s10 + $0x1] ss:$0 sm:$0xff] }
 0xcf8   : > { %v3088_v17 = vpop.f32.mrb[86].mxu0 }
 0xcf9   : > { %v4416_v18 = vpop.f32.mrb[87].mxu0  ;;  %4438 = vmatmul.mubr.msk.bf16.vlgmr.msra.gmra.mrb[92].mxu0 %vm1202_vm2, %v3184_v14 }
 0xcfa   : > { %4448 = vmatpush3.bf16.msra.mxu0 %v3334_v16  ;;  %4449 = vmatprep.mubr.msk.bf16.mxu0 %vm4695_vm0, %v4694_v1 }
 0xcfb   : > { %4461 = vmatprep.subr.bf16.mxu0 %v4694_v1 }
 0xcfe   : > { %v3177_v19 = vpop.f32.mrb[88].mxu0 }
 0xcff   : > { %v3186_v20 = vpack.c.bf16 %v3177_v19, %v3177_v19  ;;  %v4427_v21 = vpop.f32.mrb[89].mxu0 }
 0xd00   : > { %v3180_v23 = vpop.f32.mrb[90].mxu0 }
 0xd01   : > { %v4428_v24 = vpop.f32.mrb[91].mxu0  ;;  %4450 = vmatmul.mubr.msk.bf16.vlgmr.msra.gmra.mrb[96].mxu0 %vm1202_vm2, %v3186_v20 }
 0xd02   : > { %4477 = vmatprep.mubr.msk.bf16.mxu0 %vm4695_vm0, %v4694_v1 }
 0xdac   : > { %v3232_v25 = vpop.f32.mrb[92].mxu1 }
 0xdad   : > { %v4433_v26 = vpop.f32.mrb[93].mxu1  ;;  %v3376_v35 = vsel %vm536_vm1, %v3232_v25, 0.0 }
 0xdae   : > { %v3235_v27 = vpop.f32.mrb[94].mxu1 }
 0xdaf   : > { %v4434_v33 = vpop.f32.mrb[95].mxu1 }
 0xdb6   : > { %v3324_v28 = vpop.f32.mrb[96].mxu1 }
 0xdb7   : > { %v4445_v30 = vpop.f32.mrb[97].mxu1  ;;  %v3379_v38 = vsel %vm536_vm1, %v3324_v28, 0.0 }
 0xdb8   : > { %v3327_v31 = vpop.f32.mrb[98].mxu1 }
 0xdb9   : > { %v4446_v32 = vpop.f32.mrb[99].mxu1 }
 0xdcc   : > { %v3278_v34 = vpop.f32.mrb[92].mxu0 }
 0xdcd   : > { %v3377_v36 = vsel %vm536_vm1, %v3278_v34, 0.0  ;;  %v4439_v37 = vpop.f32.mrb[93].mxu0 }
 0xdce   : > { %v3378_v29 = vadd.f32 %v3377_v36, %v3376_v35  ;;  %v3281_v7 = vpop.f32.mrb[94].mxu0 }
 0xdcf   : > { %v4440_v39 = vpop.f32.mrb[95].mxu0  ;;  %v3939_v7 = vld [vmem:[%s5534_s13 + $0x1] ss:$0 sm:$0xff] }
 0xdd0   : > { %v3380_v40 = vadd.f32 %v3379_v38, %v3378_v29  ;;  %v3940_v39 = vld [vmem:[%s5535_s14 + $0x1] ss:$0 sm:$0xff] }
 0xdd4   : > { %v3370_v41 = vpop.f32.mrb[96].mxu0 }
 0xdd5   : > { %v3381_v42 = vsel %vm536_vm1, %v3370_v41, 0.0  ;;  %v4451_v44 = vpop.f32.mrb[97].mxu0 }
 0xdd6   : > { %v3382_v45 = vadd.f32 %v3381_v42, %v3380_v40  ;;  %v3373_v46 = vpop.f32.mrb[98].mxu0 }
 0xdd7   : > { %v4452_v47 = vpop.f32.mrb[99].mxu0 }
 0xdd8   : > { %v3391_v22 = vadd.f32 %v3897_v43, %v3382_v45 }
 0xdda   : > { %v3392_v48 = vadd.f32 %v3391_v22, %v5178_v0  ;;  %v4582_v0 = vld [vmem:[%s5532_s11 + $0x40] sm:$0xff]  }
 0xddb   : > { %4462 = vmatpush3.bf16.msra.mxu0 %v4582_v0 }
 0xddc   : > { %v3397_v49 = vsel %vm536_vm1, %v3392_v48, 0.0  ;;  %4463 = vmatprep.subr.bf16.mxu0 %v4694_v1 }
 0xddd   : > { %3398 = vadd.xlane.f32.xlu0 %v3397_v49 }
 0xddf   : > { %4464 = vmatpush3.bf16.msra.mxu0 %v4583_v51 }
 0xde0   : > { %4465 = vmatprep.subr.bf16.mxu0 %v4694_v1 }
 0xde3   : > { %4466 = vmatpush3.bf16.msra.mxu0 %v4584_v58 }
 0xde4   : > { %4467 = vmatprep.subr.bf16.mxu0 %v4694_v1 }
 0xde7   : > { %4468 = vmatpush3.bf16.msra.mxu0 %v4585_v59 }
 0xde8   : > { %4469 = vmatprep.subr.bf16.mxu0 %v4694_v1 }
 0xdeb   : > { %4470 = vmatpush3.bf16.msra.mxu0 %v4586_v60 }
 0xdec   : > { %4471 = vmatprep.subr.bf16.mxu0 %v4694_v1 }
 0xdef   : > { %4472 = vmatpush3.bf16.msra.mxu0 %v4587_v61 }
 0xdf0   : > { %4473 = vmatprep.subr.bf16.mxu0 %v4694_v1 }
 0xdf3   : > { %4474 = vmatpush3.bf16.msra.mxu0 %v4588_v11 }
 0xdf4   : > { %4475 = vmatprep.subr.bf16.mxu0 %v4694_v1  ;;  %v3928_v1 = vld [vmem:[%s5533_s12 + $0x1] ss:$0 sm:$0xff] }
 0xdf7   : > { %4476 = vmatpush3.bf16.msra.mxu0 %v4589_v12 }
 0xe6a   : > { %v3399_v50 = vpop.xlane.xlu0 %3398 }
 0xe6b   : > { %v3400_v52 = vmul.f32 0.03125, %v3399_v50 }
 0xe6d   : > { %v3401_v53 = vsub.f32 %v3392_v48, %v3400_v52 }
 0xe6f   : > { %v3402_v54 = vmul.f32 %v3401_v53, %v3401_v53 }
 0xe71   : > { %v3403_v55 = vsel %vm536_vm1, %v3402_v54, 0.0 }
 0xe72   : > { %3404 = vadd.xlane.f32.xlu1 %v3403_v55 }
 0xeff   : > { %v3405_v62 = vpop.xlane.xlu1 %3404 }
 0xf00   : > { %v3406_v63 = vmul.f32 0.03125, %v3405_v62 }
 0xf02   : > { %v3407_v2 = vadd.f32 1e-05, %v3406_v63 }
 0xf04   : > { %4626 = vrsqrt.f32 %v3407_v2 }
 0xf0e   : > { %v4627_v3 = vpop.eup %4626 }
 0xf0f   : > { %v3409_v5 = vmul.f32 %v4627_v3, %v3401_v53 }
 0xf11   : > { %v3416_v8 = vmul.f32 %v3900_v4, %v3409_v5 }
 0xf13   : > { %v3423_v9 = vadd.f32 %v3901_v6, %v3416_v8 }
 0xf15   : > { %v3424_v10 = vpack.c.bf16 %v3423_v9, %v3423_v9 }
 0xf17   : > { %4458 = vmatmul.mubr.msk.bf16.vlgmr.msra.gmra.mrb[100].mxu1 %vm536_vm1, %v3424_v10 }
 0xfea   : > { %v3487_v14 = vpop.f32.mrb[100].mxu1 }
 0xfeb   : > { %v3488_v15 = vadd.f32 %v3907_v13, %v3487_v14  ;;  %v4459_v16 = vpop.f32.mrb[101].mxu1 }
 0xfec   : > { %v3490_v17 = vpop.f32.mrb[102].mxu1 }
 0xfed   : > { %v3493_v18 = vmax.f32 %v3488_v15, 0.0  ;;  %v4460_v19 = vpop.f32.mrb[103].mxu1 }
 0xfef   : > { %v3494_v20 = vpack.c.bf16 %v3493_v18, %v3493_v18 }
 0xff1   : > { %4478 = vmatmul.mubr.bf16.vlgmr.msra.gmra.mrb[100].mxu0 %v3494_v20 }
0x10c4   : > { %v3602_v21 = vpop.f32.mrb[100].mxu0 }
0x10c5   : > { %v3603_v23 = vadd.f32 %v3928_v1, %v3602_v21  ;;  %v4479_v24 = vpop.f32.mrb[101].mxu0 }
0x10c6   : > { %v3605_v25 = vpop.f32.mrb[102].mxu0 }
0x10c7   : > { %v4480_v26 = vpop.f32.mrb[103].mxu0  ;;  %v3608_v27 = vadd.f32 %v3603_v23, %v3423_v9 }
0x10c9   : > { %v3613_v33 = vsel %vm536_vm1, %v3608_v27, 0.0 }
0x10ca   : > { %3614 = vadd.xlane.f32.xlu0 %v3613_v33 }
0x1157   : > { %v3615_v28 = vpop.xlane.xlu0 %3614 }
0x1158   : > { %v3616_v30 = vmul.f32 0.03125, %v3615_v28 }
0x115a   : > { %v3617_v31 = vsub.f32 %v3608_v27, %v3616_v30 }
0x115c   : > { %v3618_v32 = vmul.f32 %v3617_v31, %v3617_v31 }
0x115e   : > { %v3619_v34 = vsel %vm536_vm1, %v3618_v32, 0.0 }
0x115f   : > { %3620 = vadd.xlane.f32.xlu1 %v3619_v34 }
0x11ec   : > { %v3621_v35 = vpop.xlane.xlu1 %3620 }
0x11ed   : > { %v3622_v36 = vmul.f32 0.03125, %v3621_v35 }
0x11ef   : > { %v3623_v37 = vadd.f32 1e-05, %v3622_v36 }
0x11f1   : > { %4628 = vrsqrt.f32 %v3623_v37 }
0x11fb   : > { %v4629_v29 = vpop.eup %4628 }
0x11fc   : > { %v3625_v38 = vmul.f32 %v4629_v29, %v3617_v31 }
0x11fe   : > { %v3632_v40 = vmul.f32 %v3939_v7, %v3625_v38 }
0x1200   : > { %v3639_v41 = vadd.f32 %v3940_v39, %v3632_v40 }
0x1202   : > { %3640 = vst.msk [vmem:[%s496_s17] sm:$0xff] %vm536_vm1, %v3639_v41 }
0x1203   : > { %4643 = shalt.err (!%p4640_p3)
}
0x1204   : > { %s4644_s0 = scalar_lea.hbm %s5478_s2, 128  ;;  %s4648_s26 = scalar_lea.hbm %s5536_s15, 256 }
0x1205   : > { %p4645_p4 = scmp.ne.s32.totalorder %s5478_s2, %s4644_s0  ;;  %p4649_p9 = scmp.lt.u32.totalorder %s5478_s2, %s5536_s15 }
0x1206   : > { %p4650_p10 = scmp.lt.u32.totalorder %s4648_s26, %s4644_s0  ;;  %p4652_p12 = scmp.lt.u32.totalorder %s4644_s0, %s5478_s2 }
0x1207   : > { %p4646_p7 = pnand %p4645_p4, %p4815_p5 }
0x1208   : > { %p4651_p11 = por %p4650_p10, %p4649_p9 }
0x1209   : > { %p4647_p8 = pneg %p4646_p7 }
0x120a   : > { %p4653_p13 = por %p4652_p12, %p4651_p11 }
0x120c   : > { %p4654_p0 = pnand %p4653_p13, %p4647_p8 }
0x120e   : > { %4657 = shalt.err (!%p4654_p0)
}
0x120f   : > { %4481 = dma.vmem_to_hbm [thread:$0]  (%p4815_p5), %s5480_s16, 128, %s5478_s2, %s3642_s24  }
0x1210 PF: > { %p4487_p1 = scmp.ge.s32.totalorder %s4692_s21, 2  ;;  %s3667_s23 = sand.u32 1, %s4680_s18  }
0x1211   : > { %s3668_s22 = scalar_lea.sflag [#allocation3], %s3667_s23 }
0x1212   : > { %p4484_p2 = pnand %p4487_p1, %p4819_p6 }
0x1214   : > { %4675 = dma.done.wait (!%p4484_p2), %s3668_s22, 128  }
0x1215   : > { %4677 = vsyncadd (!%p4484_p2), %s3668_s22, 4294967168  ;;  %s5551_s21 = sld [smem:[#allocation6_spill]]  ;;  %s5552_s27 = sld [smem:[#allocation5_spill]] }
0x1216   : > { %s5553_s20 = sld [smem:[#allocation7_spill]]  ;;  %s5554_s18 = smov %s4684_s19 }
0x121b   : > { %p25_p3 = scmp.ge.s32.totalorder %s5551_s21, 4   ;;  %s5555_s19 = smov %s5552_s27 }
0x121d   :  { %27 = sbr.rel (!%p25_p3) target bundleno = 7 (0x7), region = 131 }
0x1224   :  { %3673 = vsyncpa [#allocation3], 1 }
0x1225   :  { %3675 = vsyncpa [#allocation3 + $0x1], 1 }

</bundles_post_ra>
